<compile_context>
chip_gen: v6e
topology: v6e:2x2x1
jax: 0.10.0
libtpu: 0.0.40
codegen_flags: <defaults>
</compile_context>

<pallas_src>
import math
import functools

import jax
import jax.numpy as jnp
from jax import lax
from jax.experimental import pallas as pl
from jax.experimental.pallas import tpu as pltpu


def _vmem_capacity_bytes():
    try:
        return int(pltpu.get_tpu_info().vmem_capacity_bytes)
    except Exception:
        return 128 * 1024 * 1024


def _pick_tq(S, vmem_cap):
    """Query-tile size: full S for small sequences, else the largest divisor <= cap.

    cap is generation-aware: 256 on 64 MiB-VMEM parts (v7x), 512 on 128 MiB parts.
    """
    cap = 256 if vmem_cap < 96 * 1024 * 1024 else 512
    if S <= cap:
        return S
    for t in (512, 256, 128, 64, 32, 16, 8):
        if t <= cap and S % t == 0:
            return t
    return S  # TODO(synk): pad ragged S instead of falling back to a single huge tile.


def _round_up(n, m):
    return ((n + m - 1) // m) * m


def _tile_bytes(rows, cols, itemsize):
    sub = 8 * (4 // itemsize)                      # 8 sublanes of 32 bits, packed for bf16
    return _round_up(rows, sub) * _round_up(cols, 128) * itemsize


def _vmem_budget(S, D, H, d_k, NH, tq, vmem_cap):
    scratch = (3 * H * _tile_bytes(S, d_k, 2)      # head-major Q/K/V, bf16
               + _tile_bytes(S, H, 4)              # query bucket ids
               + _tile_bytes(H, S, 4)              # key bucket ids
               + _tile_bytes(tq, D, 2))            # per-tile head-output concat, bf16
    blocks = (2 * _tile_bytes(S, D, 4)             # x (double-buffered)
              + _tile_bytes(D, 3 * D, 4) + _tile_bytes(1, 3 * D, 4)   # W_qkv / b_qkv (x1)
              + _tile_bytes(D, D, 4) + _tile_bytes(1, D, 4)           # W_o / b_o (x1)
              + _tile_bytes(H * NH, D, 4)                             # block-diag R (x1)
              + 2 * _tile_bytes(tq, D, 4))         # output tile (double-buffered)
    want = (scratch + blocks) * 3 // 2             # 1.5x headroom for spills / pipeline
    return int(min(vmem_cap, max(32 * 1024 * 1024, want)))


def _lsh_attention_kernel(x_ref, wqkv_ref, bqkv_ref, wo_ref, bo_ref, rbig_ref,
                          o_ref,
                          qh_ref, kh_ref, vh_ref, qb_ref, kb_ref, cat_ref,
                          *, num_heads, d_k, num_hashes, tq):
    """Grid = (batch, query-tile).  Per-batch K/V/bucket state lives in VMEM scratch."""
    S, D = x_ref.shape
    H, NH = num_heads, num_hashes
    t = pl.program_id(1)

    # ---- per-batch init (t == 0): fused QKV projection, LSH buckets, head-major park ----
    @pl.when(t == 0)
    def _init():
        x = x_ref[...]                                                     # (S, D) f32
        # one lane-dense (S,D)@(D,3D) MXU push; 1/sqrt(d_k) already folded into the Q third
        qkv = jnp.dot(x, wqkv_ref[...],
                      preferred_element_type=jnp.float32) + bqkv_ref[...]  # (S, 3D) f32
        q_full = qkv[:, :D]
        k_full = qkv[:, D:2 * D]
        v_full = qkv[:, 2 * D:]

        # LSH projections for all heads via two matmuls against block-diagonal R
        # (K-side produced directly in (H*NH, S) row layout, lane-dense in S).
        r_big = rbig_ref[...]                                              # (H*NH, D)
        proj_q = lax.dot_general(q_full, r_big, (((1,), (1,)), ((), ())),
                                 preferred_element_type=jnp.float32)       # (S, H*NH)
        proj_kT = lax.dot_general(r_big, k_full, (((1,), (1,)), ((), ())),
                                  preferred_element_type=jnp.float32)      # (H*NH, S)

        # first-occurrence argmax over the NH hash directions (VPU/XLU only).  Buckets are
        # computed from the f32 projections (before any bf16 downcast) so tie-breaking
        # matches the reference; ids are small exact ints stored in f32.
        iota_q = lax.broadcasted_iota(jnp.int32, (S, NH), 1).astype(jnp.float32)
        iota_k = lax.broadcasted_iota(jnp.int32, (NH, S), 0).astype(jnp.float32)
        sentinel = jnp.float32(NH)

        for h in range(H):
            lo, ho = h * d_k, h * NH
            pq = proj_q[:, ho:ho + NH]                                     # (S, NH)
            qb_ref[:, h:h + 1] = jnp.min(
                jnp.where(pq == jnp.max(pq, axis=-1, keepdims=True), iota_q, sentinel),
                axis=-1, keepdims=True)                                    # (S, 1)
            pk = proj_kT[ho:ho + NH, :]                                    # (NH, S)
            kb_ref[h:h + 1, :] = jnp.min(
                jnp.where(pk == jnp.max(pk, axis=0, keepdims=True), iota_k, sentinel),
                axis=0, keepdims=True)                                     # (1, S)
            # park Q/K/V head-major in bf16: contiguous per-head reads, half the VMEM
            qh_ref[h] = q_full[:, lo:lo + d_k].astype(qh_ref.dtype)
            kh_ref[h] = k_full[:, lo:lo + d_k].astype(kh_ref.dtype)
            vh_ref[h] = v_full[:, lo:lo + d_k].astype(vh_ref.dtype)

    # ---- per-tile attention -------------------------------------------------------------
    r0 = pl.multiple_of(t * tq, tq)
    qb_tile = qb_ref[pl.ds(r0, tq), :]                                     # (tq, H)
    kb_all = kb_ref[...]                                                   # (H, S)

    # TODO(synk): for H >= 16 switch this fully-unrolled head loop to
    # lax.fori_loop(..., unroll=2..4) with dynamic head indexing to bound vreg pressure.
    for h in range(H):
        q_h = qh_ref.at[h][pl.ds(r0, tq), :]                               # (tq, d_k) bf16
        k_h = kh_ref[h]                                                    # (S,  d_k) bf16
        v_h = vh_ref[h]                                                    # (S,  d_k) bf16

        # scores: bf16 MXU operands, f32 accumulation; softmax scale folded into W_q.
        # TODO(synk): at S >= 2-4K add a flash-style inner KV loop (online softmax) so only
        # a (tq, tk) score tile is live instead of (tq, S), especially for v7x's 64 MiB VMEM.
        s_t = lax.dot_general(q_h, k_h, (((1,), (1,)), ((), ())),
                              preferred_element_type=jnp.float32)          # (tq, S)

        mask = qb_tile[:, h:h + 1] == kb_all[h:h + 1, :]                   # (tq, S) VPU compare
        s_t = jnp.where(mask, s_t, -jnp.inf)

        m = jnp.max(s_t, axis=-1, keepdims=True)
        e = jnp.exp(s_t - m)
        l = jnp.sum(e, axis=-1, keepdims=True)
        p = (e * pl.reciprocal(l, approx=True)).astype(jnp.bfloat16)       # NaN rows stay NaN

        head_t = jnp.dot(p, v_h, preferred_element_type=jnp.float32)       # (tq, d_k)
        cat_ref[:, h * d_k:(h + 1) * d_k] = head_t.astype(cat_ref.dtype)

    # one K=D output projection per tile (full-width MXU) + bias; lane-dense (tq, D) store.
    o_ref[...] = (jnp.dot(cat_ref[...], wo_ref[...],
                          preferred_element_type=jnp.float32)
                  + bo_ref[...]).astype(o_ref.dtype)


def lsh_attention(x, params, *, num_heads, num_hashes):
    B, S, D = x.shape
    d_k = D // num_heads
    wq, bq, wk, bk, wv, bv, wo, bo, R = params

    # Fuse QKV weights/biases; fold the softmax 1/sqrt(d_k) into the Q projection
    # (argmax bucket ids are invariant to a positive scale, so LSH semantics are unchanged).
    scale = 1.0 / math.sqrt(d_k)
    w_qkv = jnp.concatenate([wq * scale, wk, wv], axis=1)          # (D, 3D)
    b_qkv = jnp.concatenate([bq * scale, bk, bv], axis=1)          # (1, 3D)
    # Block-diagonal LSH projection matrix: r_big[h*NH + r, h*d_k + d] = R[r, d]
    r_big = jnp.kron(jnp.eye(num_heads, dtype=R.dtype), R)         # (H*NH, D)
    # TODO(synk): on v7x at D >= 2048 ship w_qkv / wo in bf16 to halve resident weight VMEM.

    vmem_cap = _vmem_capacity_bytes()
    tq = _pick_tq(S, vmem_cap)
    n_qt = S // tq
    vmem_limit = _vmem_budget(S, D, num_heads, d_k, num_hashes, tq, vmem_cap)

    kernel = functools.partial(_lsh_attention_kernel, num_heads=num_heads,
                               d_k=d_k, num_hashes=num_hashes, tq=tq)
    rep = lambda b, t: (0, 0)    # weights: constant block index across the whole grid
    one = pl.Buffered(1)         # single-buffer weights (default would double-buffer each)

    return pl.pallas_call(
        kernel,
        out_shape=jax.ShapeDtypeStruct((B, S, D), x.dtype),
        grid_spec=pltpu.PrefetchScalarGridSpec(
            num_scalar_prefetch=0,
            grid=(B, n_qt),
            in_specs=[
                # full-sequence x of batch b (block index constant across the tile axis,
                # so it is only DMA'd when b changes)
                pl.BlockSpec((None, S, D), lambda b, t: (b, 0, 0)),
                pl.BlockSpec((D, 3 * D), rep, pipeline_mode=one),   # fused W_qkv (scale folded)
                pl.BlockSpec((1, 3 * D), rep, pipeline_mode=one),   # fused b_qkv
                pl.BlockSpec((D, D), rep, pipeline_mode=one),       # W_o
                pl.BlockSpec((1, D), rep, pipeline_mode=one),       # b_o
                pl.BlockSpec((num_heads * num_hashes, D), rep, pipeline_mode=one),  # block-diag R
            ],
            out_specs=pl.BlockSpec((None, tq, D), lambda b, t: (b, t, 0)),
            scratch_shapes=[
                pltpu.VMEM((num_heads, S, d_k), jnp.bfloat16),   # Q, head-major
                pltpu.VMEM((num_heads, S, d_k), jnp.bfloat16),   # K, head-major
                pltpu.VMEM((num_heads, S, d_k), jnp.bfloat16),   # V, head-major
                pltpu.VMEM((S, num_heads), jnp.float32),         # query bucket ids
                pltpu.VMEM((num_heads, S), jnp.float32),         # key bucket ids
                pltpu.VMEM((tq, D), jnp.bfloat16),               # per-tile head-output concat
            ],
        ),
        compiler_params=pltpu.CompilerParams(
            # batch elements are independent -> megacore-shardable; the tile axis carries
            # per-batch scratch (K/V/buckets written at t == 0) so it must stay "arbitrary".
            dimension_semantics=("parallel", "arbitrary"),
            vmem_limit_bytes=vmem_limit),
    )(x, w_qkv, b_qkv, wo, bo, r_big)


def lsh_attention_ref(x, params, *, num_heads, num_hashes):
    """Pure-JAX reference with identical (intended) semantics."""
    wq, bq, wk, bk, wv, bv, wo, bo, R = params
    B, S, D = x.shape
    d_k = D // num_heads

    def proj(w, b):
        return (x @ w + b).reshape(B, S, num_heads, d_k)

    Q, K, V = proj(wq, bq), proj(wk, bk), proj(wv, bv)
    qb = jnp.argmax(jnp.einsum('bshd,rd->bshr', Q, R), axis=-1)   # (B,S,H)
    kb = jnp.argmax(jnp.einsum('bshd,rd->bshr', K, R), axis=-1)
    mask = (qb.transpose(0, 2, 1)[:, :, :, None] ==
            kb.transpose(0, 2, 1)[:, :, None, :])                 # (B,H,S,S)

    Qh, Kh, Vh = (t.transpose(0, 2, 1, 3) for t in (Q, K, V))
    scores = jnp.einsum('bhqd,bhkd->bhqk', Qh, Kh) / math.sqrt(d_k)
    scores = jnp.where(mask, scores, -jnp.inf)
    m = jnp.max(scores, axis=-1, keepdims=True)
    e = jnp.exp(scores - m)
    probs = e / jnp.sum(e, axis=-1, keepdims=True)
    out = jnp.einsum('bhqk,bhkd->bhqd', probs, Vh)
    out = out.transpose(0, 2, 1, 3).reshape(B, S, D)
    return out @ wo + bo


if __name__ == "__main__":
    import numpy as np

    B, S, D, H, NH = 2, 8, 32, 4, 8       # batch, seq, d_model, num_heads, num_hashes
    d_k = D // H

    key = jax.random.PRNGKey(0)
    ks = jax.random.split(key, 10)
    w_scale = 0.2
    x  = jax.random.normal(ks[0], (B, S, D), jnp.float32)
    wq = jax.random.normal(ks[1], (D, D), jnp.float32) * w_scale
    bq = jax.random.normal(ks[2], (1, D), jnp.float32) * w_scale
    wk = jax.random.normal(ks[3], (D, D), jnp.float32) * w_scale
    bk = jax.random.normal(ks[4], (1, D), jnp.float32) * w_scale
    wv = jax.random.normal(ks[5], (D, D), jnp.float32) * w_scale
    bv = jax.random.normal(ks[6], (1, D), jnp.float32) * w_scale
    wo = jax.random.normal(ks[7], (D, D), jnp.float32) * w_scale
    bo = jax.random.normal(ks[8], (1, D), jnp.float32) * w_scale
    R  = jax.random.normal(ks[9], (NH, d_k), jnp.float32)
    params = (wq, bq, wk, bk, wv, bv, wo, bo, R)

    out = lsh_attention(x, params, num_heads=H, num_hashes=NH)
    out = jax.block_until_ready(out)

    ref = jax.block_until_ready(lsh_attention_ref(x, params, num_heads=H, num_hashes=NH))
    # Tolerance reflects bf16 storage of Q/K/V/concat (MXU-native dtype, f32 accumulation)
    # plus the EUP approximate reciprocal in the softmax; bucket ids themselves are computed
    # in f32 so the sparsity pattern matches the reference exactly.  Fully-masked rows are
    # NaN in both (equal_nan=True), matching torch.softmax of an all -inf row.
    np.testing.assert_allclose(np.asarray(out), np.asarray(ref),
                               rtol=2e-2, atol=2e-2, equal_nan=True)

    print("KERNEL_OK")
</pallas_src>

<mosaic_0001>
module attributes {stable_mosaic.version = 11 : i64} {
  func.func @_lsh_attention_kernel(%arg0: i32, %arg1: i32, %arg2: memref<1x8x32xf32, #tpu.memory_space<vmem>>, %arg3: memref<32x96xf32, #tpu.memory_space<vmem>>, %arg4: memref<1x96xf32, #tpu.memory_space<vmem>>, %arg5: memref<32x32xf32, #tpu.memory_space<vmem>>, %arg6: memref<1x32xf32, #tpu.memory_space<vmem>>, %arg7: memref<32x32xf32, #tpu.memory_space<vmem>>, %arg8: memref<1x8x32xf32, #tpu.memory_space<vmem>>, %arg9: memref<4x8x8xbf16, #tpu.memory_space<vmem>>, %arg10: memref<4x8x8xbf16, #tpu.memory_space<vmem>>, %arg11: memref<4x8x8xbf16, #tpu.memory_space<vmem>>, %arg12: memref<8x4xf32, #tpu.memory_space<vmem>>, %arg13: memref<4x8xf32, #tpu.memory_space<vmem>>, %arg14: memref<8x32xbf16, #tpu.memory_space<vmem>>) attributes {dimension_semantics = [#tpu.dimension_semantics<parallel>, #tpu.dimension_semantics<arbitrary>], iteration_bounds = array<i64: 2, 1>, scalar_prefetch = 0 : i64, scratch_operands = 6 : i64, tpu.core_type = #tpu.core_type<tc>, window_params = [{transform_indices = @transform_0, window_bounds = array<i64: 1, 8, 32>}, {pipeline_mode = #tpu.pipeline_mode<synchronous>, transform_indices = @transform_1, window_bounds = array<i64: 32, 96>}, {pipeline_mode = #tpu.pipeline_mode<synchronous>, transform_indices = @transform_2, window_bounds = array<i64: 1, 96>}, {pipeline_mode = #tpu.pipeline_mode<synchronous>, transform_indices = @transform_3, window_bounds = array<i64: 32, 32>}, {pipeline_mode = #tpu.pipeline_mode<synchronous>, transform_indices = @transform_4, window_bounds = array<i64: 1, 32>}, {pipeline_mode = #tpu.pipeline_mode<synchronous>, transform_indices = @transform_5, window_bounds = array<i64: 32, 32>}, {transform_indices = @transform_6, window_bounds = array<i64: 1, 8, 32>}]} {
    %c0_i32 = arith.constant 0 : i32
    %0 = arith.cmpi eq, %arg1, %c0_i32 : i32
    %1 = arith.extui %0 : i1 to i32
    %c0_i32_0 = arith.constant 0 : i32
    %2 = arith.cmpi ne, %1, %c0_i32_0 : i32
    scf.if %2 {
      %c0_71 = arith.constant 0 : index
      %c0_72 = arith.constant 0 : index
      %c0_73 = arith.constant 0 : index
      %137 = vector.load %arg2[%c0_71, %c0_72, %c0_73] : memref<1x8x32xf32, #tpu.memory_space<vmem>>, vector<1x8x32xf32>
      %138 = vector.shape_cast %137 : vector<1x8x32xf32> to vector<8x32xf32>
      %c0_74 = arith.constant 0 : index
      %c0_75 = arith.constant 0 : index
      %139 = vector.load %arg3[%c0_74, %c0_75] : memref<32x96xf32, #tpu.memory_space<vmem>>, vector<32x96xf32>
      %cst_76 = arith.constant dense<0.000000e+00> : vector<8x96xf32>
      %140 = tpu.matmul %138, %139, %cst_76 {dimension_numbers = #tpu.dot_dimension_numbers<[1], [0], [0], [1], [0, 0, 1, 1], [], []>} : vector<8x32xf32>, vector<32x96xf32>, vector<8x96xf32> -> vector<8x96xf32>
      %c0_77 = arith.constant 0 : index
      %c0_78 = arith.constant 0 : index
      %141 = vector.load %arg4[%c0_77, %c0_78] : memref<1x96xf32, #tpu.memory_space<vmem>>, vector<1x96xf32>
      %142 = vector.broadcast %141 : vector<1x96xf32> to vector<8x96xf32>
      %143 = arith.addf %140, %142 : vector<8x96xf32>
      %144 = vector.extract_strided_slice %143 {offsets = [0, 0], sizes = [8, 32], strides = [1, 1]} : vector<8x96xf32> to vector<8x32xf32>
      %145 = vector.extract_strided_slice %143 {offsets = [0, 32], sizes = [8, 32], strides = [1, 1]} : vector<8x96xf32> to vector<8x32xf32>
      %146 = vector.extract_strided_slice %143 {offsets = [0, 64], sizes = [8, 32], strides = [1, 1]} : vector<8x96xf32> to vector<8x32xf32>
      %c0_79 = arith.constant 0 : index
      %c0_80 = arith.constant 0 : index
      %147 = vector.load %arg7[%c0_79, %c0_80] : memref<32x32xf32, #tpu.memory_space<vmem>>, vector<32x32xf32>
      %cst_81 = arith.constant dense<0.000000e+00> : vector<8x32xf32>
      %148 = tpu.matmul %144, %147, %cst_81 {dimension_numbers = #tpu.dot_dimension_numbers<[1], [1], [0], [0], [0, 0, 1, 0], [], []>} : vector<8x32xf32>, vector<32x32xf32>, vector<8x32xf32> -> vector<8x32xf32>
      %cst_82 = arith.constant dense<0.000000e+00> : vector<32x8xf32>
      %149 = tpu.matmul %147, %145, %cst_82 {dimension_numbers = #tpu.dot_dimension_numbers<[1], [1], [0], [0], [0, 0, 1, 0], [], []>} : vector<32x32xf32>, vector<8x32xf32>, vector<32x8xf32> -> vector<32x8xf32>
      %150 = tpu.iota {dimensions = array<i32: 1>} : vector<8x8xi32>
      %151 = arith.sitofp %150 : vector<8x8xi32> to vector<8x8xf32>
      %152 = tpu.iota {dimensions = array<i32: 0>} : vector<8x8xi32>
      %153 = arith.sitofp %152 : vector<8x8xi32> to vector<8x8xf32>
      %154 = vector.extract_strided_slice %148 {offsets = [0, 0], sizes = [8, 8], strides = [1, 1]} : vector<8x32xf32> to vector<8x8xf32>
      %cst_83 = arith.constant dense<0xFF800000> : vector<8xf32>
      %155 = vector.multi_reduction <maximumf>, %154, %cst_83 [1] : vector<8x8xf32> to vector<8xf32>
      %156 = vector.shape_cast %155 : vector<8xf32> to vector<8x1xf32>
      %157 = vector.broadcast %156 : vector<8x1xf32> to vector<8x8xf32>
      %158 = arith.cmpf oeq, %154, %157 : vector<8x8xf32>
      %cst_84 = arith.constant 8.000000e+00 : f32
      %159 = vector.broadcast %cst_84 : f32 to vector<8x8xf32>
      %160 = arith.select %158, %151, %159 : vector<8x8xi1>, vector<8x8xf32>
      %cst_85 = arith.constant dense<0x7F800000> : vector<8xf32>
      %161 = vector.multi_reduction <minimumf>, %160, %cst_85 [1] : vector<8x8xf32> to vector<8xf32>
      %162 = vector.shape_cast %161 : vector<8xf32> to vector<8x1xf32>
      %c0_86 = arith.constant 0 : index
      %c0_87 = arith.constant 0 : index
      %163 = vector.load %arg12[%c0_86, %c0_87] : memref<8x4xf32, #tpu.memory_space<vmem>>, vector<8x1xf32>
      tpu.vector_store %arg12[%c0_86, %c0_87], %162 {strides = array<i32>} : memref<8x4xf32, #tpu.memory_space<vmem>>, vector<8x1xf32>,
      %164 = vector.extract_strided_slice %149 {offsets = [0, 0], sizes = [8, 8], strides = [1, 1]} : vector<32x8xf32> to vector<8x8xf32>
      %cst_88 = arith.constant dense<0xFF800000> : vector<8xf32>
      %165 = vector.multi_reduction <maximumf>, %164, %cst_88 [0] : vector<8x8xf32> to vector<8xf32>
      %166 = vector.shape_cast %165 : vector<8xf32> to vector<1x8xf32>
      %167 = vector.broadcast %166 : vector<1x8xf32> to vector<8x8xf32>
      %168 = arith.cmpf oeq, %164, %167 : vector<8x8xf32>
      %cst_89 = arith.constant 8.000000e+00 : f32
      %169 = vector.broadcast %cst_89 : f32 to vector<8x8xf32>
      %170 = arith.select %168, %153, %169 : vector<8x8xi1>, vector<8x8xf32>
      %cst_90 = arith.constant dense<0x7F800000> : vector<8xf32>
      %171 = vector.multi_reduction <minimumf>, %170, %cst_90 [0] : vector<8x8xf32> to vector<8xf32>
      %172 = vector.shape_cast %171 : vector<8xf32> to vector<1x8xf32>
      %c0_91 = arith.constant 0 : index
      %c0_92 = arith.constant 0 : index
      %173 = vector.load %arg13[%c0_91, %c0_92] : memref<4x8xf32, #tpu.memory_space<vmem>>, vector<1x8xf32>
      tpu.vector_store %arg13[%c0_91, %c0_92], %172 {strides = array<i32>} : memref<4x8xf32, #tpu.memory_space<vmem>>, vector<1x8xf32>,
      %174 = vector.extract_strided_slice %144 {offsets = [0, 0], sizes = [8, 8], strides = [1, 1]} : vector<8x32xf32> to vector<8x8xf32>
      %175 = arith.truncf %174 : vector<8x8xf32> to vector<8x8xbf16>
      %c0_93 = arith.constant 0 : index
      %c0_94 = arith.constant 0 : index
      %c0_95 = arith.constant 0 : index
      %176 = vector.load %arg9[%c0_93, %c0_94, %c0_95] : memref<4x8x8xbf16, #tpu.memory_space<vmem>>, vector<1x8x8xbf16>
      %177 = vector.shape_cast %176 : vector<1x8x8xbf16> to vector<8x8xbf16>
      %178 = vector.shape_cast %175 : vector<8x8xbf16> to vector<1x8x8xbf16>
      tpu.vector_store %arg9[%c0_93, %c0_94, %c0_95], %178 {strides = array<i32>} : memref<4x8x8xbf16, #tpu.memory_space<vmem>>, vector<1x8x8xbf16>,
      %179 = vector.extract_strided_slice %145 {offsets = [0, 0], sizes = [8, 8], strides = [1, 1]} : vector<8x32xf32> to vector<8x8xf32>
      %180 = arith.truncf %179 : vector<8x8xf32> to vector<8x8xbf16>
      %c0_96 = arith.constant 0 : index
      %c0_97 = arith.constant 0 : index
      %c0_98 = arith.constant 0 : index
      %181 = vector.load %arg10[%c0_96, %c0_97, %c0_98] : memref<4x8x8xbf16, #tpu.memory_space<vmem>>, vector<1x8x8xbf16>
      %182 = vector.shape_cast %181 : vector<1x8x8xbf16> to vector<8x8xbf16>
      %183 = vector.shape_cast %180 : vector<8x8xbf16> to vector<1x8x8xbf16>
      tpu.vector_store %arg10[%c0_96, %c0_97, %c0_98], %183 {strides = array<i32>} : memref<4x8x8xbf16, #tpu.memory_space<vmem>>, vector<1x8x8xbf16>,
      %184 = vector.extract_strided_slice %146 {offsets = [0, 0], sizes = [8, 8], strides = [1, 1]} : vector<8x32xf32> to vector<8x8xf32>
      %185 = arith.truncf %184 : vector<8x8xf32> to vector<8x8xbf16>
      %c0_99 = arith.constant 0 : index
      %c0_100 = arith.constant 0 : index
      %c0_101 = arith.constant 0 : index
      %186 = vector.load %arg11[%c0_99, %c0_100, %c0_101] : memref<4x8x8xbf16, #tpu.memory_space<vmem>>, vector<1x8x8xbf16>
      %187 = vector.shape_cast %186 : vector<1x8x8xbf16> to vector<8x8xbf16>
      %188 = vector.shape_cast %185 : vector<8x8xbf16> to vector<1x8x8xbf16>
      tpu.vector_store %arg11[%c0_99, %c0_100, %c0_101], %188 {strides = array<i32>} : memref<4x8x8xbf16, #tpu.memory_space<vmem>>, vector<1x8x8xbf16>,
      %189 = vector.extract_strided_slice %148 {offsets = [0, 8], sizes = [8, 8], strides = [1, 1]} : vector<8x32xf32> to vector<8x8xf32>
      %cst_102 = arith.constant dense<0xFF800000> : vector<8xf32>
      %190 = vector.multi_reduction <maximumf>, %189, %cst_102 [1] : vector<8x8xf32> to vector<8xf32>
      %191 = vector.shape_cast %190 : vector<8xf32> to vector<8x1xf32>
      %192 = vector.broadcast %191 : vector<8x1xf32> to vector<8x8xf32>
      %193 = arith.cmpf oeq, %189, %192 : vector<8x8xf32>
      %cst_103 = arith.constant 8.000000e+00 : f32
      %194 = vector.broadcast %cst_103 : f32 to vector<8x8xf32>
      %195 = arith.select %193, %151, %194 : vector<8x8xi1>, vector<8x8xf32>
      %cst_104 = arith.constant dense<0x7F800000> : vector<8xf32>
      %196 = vector.multi_reduction <minimumf>, %195, %cst_104 [1] : vector<8x8xf32> to vector<8xf32>
      %197 = vector.shape_cast %196 : vector<8xf32> to vector<8x1xf32>
      %c0_105 = arith.constant 0 : index
      %c1_106 = arith.constant 1 : index
      %198 = vector.load %arg12[%c0_105, %c1_106] : memref<8x4xf32, #tpu.memory_space<vmem>>, vector<8x1xf32>
      tpu.vector_store %arg12[%c0_105, %c1_106], %197 {strides = array<i32>} : memref<8x4xf32, #tpu.memory_space<vmem>>, vector<8x1xf32>,
      %199 = vector.extract_strided_slice %149 {offsets = [8, 0], sizes = [8, 8], strides = [1, 1]} : vector<32x8xf32> to vector<8x8xf32>
      %cst_107 = arith.constant dense<0xFF800000> : vector<8xf32>
      %200 = vector.multi_reduction <maximumf>, %199, %cst_107 [0] : vector<8x8xf32> to vector<8xf32>
      %201 = vector.shape_cast %200 : vector<8xf32> to vector<1x8xf32>
      %202 = vector.broadcast %201 : vector<1x8xf32> to vector<8x8xf32>
      %203 = arith.cmpf oeq, %199, %202 : vector<8x8xf32>
      %cst_108 = arith.constant 8.000000e+00 : f32
      %204 = vector.broadcast %cst_108 : f32 to vector<8x8xf32>
      %205 = arith.select %203, %153, %204 : vector<8x8xi1>, vector<8x8xf32>
      %cst_109 = arith.constant dense<0x7F800000> : vector<8xf32>
      %206 = vector.multi_reduction <minimumf>, %205, %cst_109 [0] : vector<8x8xf32> to vector<8xf32>
      %207 = vector.shape_cast %206 : vector<8xf32> to vector<1x8xf32>
      %c1_110 = arith.constant 1 : index
      %c0_111 = arith.constant 0 : index
      %208 = vector.load %arg13[%c1_110, %c0_111] : memref<4x8xf32, #tpu.memory_space<vmem>>, vector<1x8xf32>
      tpu.vector_store %arg13[%c1_110, %c0_111], %207 {strides = array<i32>} : memref<4x8xf32, #tpu.memory_space<vmem>>, vector<1x8xf32>,
      %209 = vector.extract_strided_slice %144 {offsets = [0, 8], sizes = [8, 8], strides = [1, 1]} : vector<8x32xf32> to vector<8x8xf32>
      %210 = arith.truncf %209 : vector<8x8xf32> to vector<8x8xbf16>
      %c1_112 = arith.constant 1 : index
      %c0_113 = arith.constant 0 : index
      %c0_114 = arith.constant 0 : index
      %211 = vector.load %arg9[%c1_112, %c0_113, %c0_114] : memref<4x8x8xbf16, #tpu.memory_space<vmem>>, vector<1x8x8xbf16>
      %212 = vector.shape_cast %211 : vector<1x8x8xbf16> to vector<8x8xbf16>
      %213 = vector.shape_cast %210 : vector<8x8xbf16> to vector<1x8x8xbf16>
      tpu.vector_store %arg9[%c1_112, %c0_113, %c0_114], %213 {strides = array<i32>} : memref<4x8x8xbf16, #tpu.memory_space<vmem>>, vector<1x8x8xbf16>,
      %214 = vector.extract_strided_slice %145 {offsets = [0, 8], sizes = [8, 8], strides = [1, 1]} : vector<8x32xf32> to vector<8x8xf32>
      %215 = arith.truncf %214 : vector<8x8xf32> to vector<8x8xbf16>
      %c1_115 = arith.constant 1 : index
      %c0_116 = arith.constant 0 : index
      %c0_117 = arith.constant 0 : index
      %216 = vector.load %arg10[%c1_115, %c0_116, %c0_117] : memref<4x8x8xbf16, #tpu.memory_space<vmem>>, vector<1x8x8xbf16>
      %217 = vector.shape_cast %216 : vector<1x8x8xbf16> to vector<8x8xbf16>
      %218 = vector.shape_cast %215 : vector<8x8xbf16> to vector<1x8x8xbf16>
      tpu.vector_store %arg10[%c1_115, %c0_116, %c0_117], %218 {strides = array<i32>} : memref<4x8x8xbf16, #tpu.memory_space<vmem>>, vector<1x8x8xbf16>,
      %219 = vector.extract_strided_slice %146 {offsets = [0, 8], sizes = [8, 8], strides = [1, 1]} : vector<8x32xf32> to vector<8x8xf32>
      %220 = arith.truncf %219 : vector<8x8xf32> to vector<8x8xbf16>
      %c1_118 = arith.constant 1 : index
      %c0_119 = arith.constant 0 : index
      %c0_120 = arith.constant 0 : index
      %221 = vector.load %arg11[%c1_118, %c0_119, %c0_120] : memref<4x8x8xbf16, #tpu.memory_space<vmem>>, vector<1x8x8xbf16>
      %222 = vector.shape_cast %221 : vector<1x8x8xbf16> to vector<8x8xbf16>
      %223 = vector.shape_cast %220 : vector<8x8xbf16> to vector<1x8x8xbf16>
      tpu.vector_store %arg11[%c1_118, %c0_119, %c0_120], %223 {strides = array<i32>} : memref<4x8x8xbf16, #tpu.memory_space<vmem>>, vector<1x8x8xbf16>,
      %224 = vector.extract_strided_slice %148 {offsets = [0, 16], sizes = [8, 8], strides = [1, 1]} : vector<8x32xf32> to vector<8x8xf32>
      %cst_121 = arith.constant dense<0xFF800000> : vector<8xf32>
      %225 = vector.multi_reduction <maximumf>, %224, %cst_121 [1] : vector<8x8xf32> to vector<8xf32>
      %226 = vector.shape_cast %225 : vector<8xf32> to vector<8x1xf32>
      %227 = vector.broadcast %226 : vector<8x1xf32> to vector<8x8xf32>
      %228 = arith.cmpf oeq, %224, %227 : vector<8x8xf32>
      %cst_122 = arith.constant 8.000000e+00 : f32
      %229 = vector.broadcast %cst_122 : f32 to vector<8x8xf32>
      %230 = arith.select %228, %151, %229 : vector<8x8xi1>, vector<8x8xf32>
      %cst_123 = arith.constant dense<0x7F800000> : vector<8xf32>
      %231 = vector.multi_reduction <minimumf>, %230, %cst_123 [1] : vector<8x8xf32> to vector<8xf32>
      %232 = vector.shape_cast %231 : vector<8xf32> to vector<8x1xf32>
      %c0_124 = arith.constant 0 : index
      %c2_125 = arith.constant 2 : index
      %233 = vector.load %arg12[%c0_124, %c2_125] : memref<8x4xf32, #tpu.memory_space<vmem>>, vector<8x1xf32>
      tpu.vector_store %arg12[%c0_124, %c2_125], %232 {strides = array<i32>} : memref<8x4xf32, #tpu.memory_space<vmem>>, vector<8x1xf32>,
      %234 = vector.extract_strided_slice %149 {offsets = [16, 0], sizes = [8, 8], strides = [1, 1]} : vector<32x8xf32> to vector<8x8xf32>
      %cst_126 = arith.constant dense<0xFF800000> : vector<8xf32>
      %235 = vector.multi_reduction <maximumf>, %234, %cst_126 [0] : vector<8x8xf32> to vector<8xf32>
      %236 = vector.shape_cast %235 : vector<8xf32> to vector<1x8xf32>
      %237 = vector.broadcast %236 : vector<1x8xf32> to vector<8x8xf32>
      %238 = arith.cmpf oeq, %234, %237 : vector<8x8xf32>
      %cst_127 = arith.constant 8.000000e+00 : f32
      %239 = vector.broadcast %cst_127 : f32 to vector<8x8xf32>
      %240 = arith.select %238, %153, %239 : vector<8x8xi1>, vector<8x8xf32>
      %cst_128 = arith.constant dense<0x7F800000> : vector<8xf32>
      %241 = vector.multi_reduction <minimumf>, %240, %cst_128 [0] : vector<8x8xf32> to vector<8xf32>
      %242 = vector.shape_cast %241 : vector<8xf32> to vector<1x8xf32>
      %c2_129 = arith.constant 2 : index
      %c0_130 = arith.constant 0 : index
      %243 = vector.load %arg13[%c2_129, %c0_130] : memref<4x8xf32, #tpu.memory_space<vmem>>, vector<1x8xf32>
      tpu.vector_store %arg13[%c2_129, %c0_130], %242 {strides = array<i32>} : memref<4x8xf32, #tpu.memory_space<vmem>>, vector<1x8xf32>,
      %244 = vector.extract_strided_slice %144 {offsets = [0, 16], sizes = [8, 8], strides = [1, 1]} : vector<8x32xf32> to vector<8x8xf32>
      %245 = arith.truncf %244 : vector<8x8xf32> to vector<8x8xbf16>
      %c2_131 = arith.constant 2 : index
      %c0_132 = arith.constant 0 : index
      %c0_133 = arith.constant 0 : index
      %246 = vector.load %arg9[%c2_131, %c0_132, %c0_133] : memref<4x8x8xbf16, #tpu.memory_space<vmem>>, vector<1x8x8xbf16>
      %247 = vector.shape_cast %246 : vector<1x8x8xbf16> to vector<8x8xbf16>
      %248 = vector.shape_cast %245 : vector<8x8xbf16> to vector<1x8x8xbf16>
      tpu.vector_store %arg9[%c2_131, %c0_132, %c0_133], %248 {strides = array<i32>} : memref<4x8x8xbf16, #tpu.memory_space<vmem>>, vector<1x8x8xbf16>,
      %249 = vector.extract_strided_slice %145 {offsets = [0, 16], sizes = [8, 8], strides = [1, 1]} : vector<8x32xf32> to vector<8x8xf32>
      %250 = arith.truncf %249 : vector<8x8xf32> to vector<8x8xbf16>
      %c2_134 = arith.constant 2 : index
      %c0_135 = arith.constant 0 : index
      %c0_136 = arith.constant 0 : index
      %251 = vector.load %arg10[%c2_134, %c0_135, %c0_136] : memref<4x8x8xbf16, #tpu.memory_space<vmem>>, vector<1x8x8xbf16>
      %252 = vector.shape_cast %251 : vector<1x8x8xbf16> to vector<8x8xbf16>
      %253 = vector.shape_cast %250 : vector<8x8xbf16> to vector<1x8x8xbf16>
      tpu.vector_store %arg10[%c2_134, %c0_135, %c0_136], %253 {strides = array<i32>} : memref<4x8x8xbf16, #tpu.memory_space<vmem>>, vector<1x8x8xbf16>,
      %254 = vector.extract_strided_slice %146 {offsets = [0, 16], sizes = [8, 8], strides = [1, 1]} : vector<8x32xf32> to vector<8x8xf32>
      %255 = arith.truncf %254 : vector<8x8xf32> to vector<8x8xbf16>
      %c2_137 = arith.constant 2 : index
      %c0_138 = arith.constant 0 : index
      %c0_139 = arith.constant 0 : index
      %256 = vector.load %arg11[%c2_137, %c0_138, %c0_139] : memref<4x8x8xbf16, #tpu.memory_space<vmem>>, vector<1x8x8xbf16>
      %257 = vector.shape_cast %256 : vector<1x8x8xbf16> to vector<8x8xbf16>
      %258 = vector.shape_cast %255 : vector<8x8xbf16> to vector<1x8x8xbf16>
      tpu.vector_store %arg11[%c2_137, %c0_138, %c0_139], %258 {strides = array<i32>} : memref<4x8x8xbf16, #tpu.memory_space<vmem>>, vector<1x8x8xbf16>,
      %259 = vector.extract_strided_slice %148 {offsets = [0, 24], sizes = [8, 8], strides = [1, 1]} : vector<8x32xf32> to vector<8x8xf32>
      %cst_140 = arith.constant dense<0xFF800000> : vector<8xf32>
      %260 = vector.multi_reduction <maximumf>, %259, %cst_140 [1] : vector<8x8xf32> to vector<8xf32>
      %261 = vector.shape_cast %260 : vector<8xf32> to vector<8x1xf32>
      %262 = vector.broadcast %261 : vector<8x1xf32> to vector<8x8xf32>
      %263 = arith.cmpf oeq, %259, %262 : vector<8x8xf32>
      %cst_141 = arith.constant 8.000000e+00 : f32
      %264 = vector.broadcast %cst_141 : f32 to vector<8x8xf32>
      %265 = arith.select %263, %151, %264 : vector<8x8xi1>, vector<8x8xf32>
      %cst_142 = arith.constant dense<0x7F800000> : vector<8xf32>
      %266 = vector.multi_reduction <minimumf>, %265, %cst_142 [1] : vector<8x8xf32> to vector<8xf32>
      %267 = vector.shape_cast %266 : vector<8xf32> to vector<8x1xf32>
      %c0_143 = arith.constant 0 : index
      %c3_144 = arith.constant 3 : index
      %268 = vector.load %arg12[%c0_143, %c3_144] : memref<8x4xf32, #tpu.memory_space<vmem>>, vector<8x1xf32>
      tpu.vector_store %arg12[%c0_143, %c3_144], %267 {strides = array<i32>} : memref<8x4xf32, #tpu.memory_space<vmem>>, vector<8x1xf32>,
      %269 = vector.extract_strided_slice %149 {offsets = [24, 0], sizes = [8, 8], strides = [1, 1]} : vector<32x8xf32> to vector<8x8xf32>
      %cst_145 = arith.constant dense<0xFF800000> : vector<8xf32>
      %270 = vector.multi_reduction <maximumf>, %269, %cst_145 [0] : vector<8x8xf32> to vector<8xf32>
      %271 = vector.shape_cast %270 : vector<8xf32> to vector<1x8xf32>
      %272 = vector.broadcast %271 : vector<1x8xf32> to vector<8x8xf32>
      %273 = arith.cmpf oeq, %269, %272 : vector<8x8xf32>
      %cst_146 = arith.constant 8.000000e+00 : f32
      %274 = vector.broadcast %cst_146 : f32 to vector<8x8xf32>
      %275 = arith.select %273, %153, %274 : vector<8x8xi1>, vector<8x8xf32>
      %cst_147 = arith.constant dense<0x7F800000> : vector<8xf32>
      %276 = vector.multi_reduction <minimumf>, %275, %cst_147 [0] : vector<8x8xf32> to vector<8xf32>
      %277 = vector.shape_cast %276 : vector<8xf32> to vector<1x8xf32>
      %c3_148 = arith.constant 3 : index
      %c0_149 = arith.constant 0 : index
      %278 = vector.load %arg13[%c3_148, %c0_149] : memref<4x8xf32, #tpu.memory_space<vmem>>, vector<1x8xf32>
      tpu.vector_store %arg13[%c3_148, %c0_149], %277 {strides = array<i32>} : memref<4x8xf32, #tpu.memory_space<vmem>>, vector<1x8xf32>,
      %279 = vector.extract_strided_slice %144 {offsets = [0, 24], sizes = [8, 8], strides = [1, 1]} : vector<8x32xf32> to vector<8x8xf32>
      %280 = arith.truncf %279 : vector<8x8xf32> to vector<8x8xbf16>
      %c3_150 = arith.constant 3 : index
      %c0_151 = arith.constant 0 : index
      %c0_152 = arith.constant 0 : index
      %281 = vector.load %arg9[%c3_150, %c0_151, %c0_152] : memref<4x8x8xbf16, #tpu.memory_space<vmem>>, vector<1x8x8xbf16>
      %282 = vector.shape_cast %281 : vector<1x8x8xbf16> to vector<8x8xbf16>
      %283 = vector.shape_cast %280 : vector<8x8xbf16> to vector<1x8x8xbf16>
      tpu.vector_store %arg9[%c3_150, %c0_151, %c0_152], %283 {strides = array<i32>} : memref<4x8x8xbf16, #tpu.memory_space<vmem>>, vector<1x8x8xbf16>,
      %284 = vector.extract_strided_slice %145 {offsets = [0, 24], sizes = [8, 8], strides = [1, 1]} : vector<8x32xf32> to vector<8x8xf32>
      %285 = arith.truncf %284 : vector<8x8xf32> to vector<8x8xbf16>
      %c3_153 = arith.constant 3 : index
      %c0_154 = arith.constant 0 : index
      %c0_155 = arith.constant 0 : index
      %286 = vector.load %arg10[%c3_153, %c0_154, %c0_155] : memref<4x8x8xbf16, #tpu.memory_space<vmem>>, vector<1x8x8xbf16>
      %287 = vector.shape_cast %286 : vector<1x8x8xbf16> to vector<8x8xbf16>
      %288 = vector.shape_cast %285 : vector<8x8xbf16> to vector<1x8x8xbf16>
      tpu.vector_store %arg10[%c3_153, %c0_154, %c0_155], %288 {strides = array<i32>} : memref<4x8x8xbf16, #tpu.memory_space<vmem>>, vector<1x8x8xbf16>,
      %289 = vector.extract_strided_slice %146 {offsets = [0, 24], sizes = [8, 8], strides = [1, 1]} : vector<8x32xf32> to vector<8x8xf32>
      %290 = arith.truncf %289 : vector<8x8xf32> to vector<8x8xbf16>
      %c3_156 = arith.constant 3 : index
      %c0_157 = arith.constant 0 : index
      %c0_158 = arith.constant 0 : index
      %291 = vector.load %arg11[%c3_156, %c0_157, %c0_158] : memref<4x8x8xbf16, #tpu.memory_space<vmem>>, vector<1x8x8xbf16>
      %292 = vector.shape_cast %291 : vector<1x8x8xbf16> to vector<8x8xbf16>
      %293 = vector.shape_cast %290 : vector<8x8xbf16> to vector<1x8x8xbf16>
      tpu.vector_store %arg11[%c3_156, %c0_157, %c0_158], %293 {strides = array<i32>} : memref<4x8x8xbf16, #tpu.memory_space<vmem>>, vector<1x8x8xbf16>,
    } else {
    }
    %c8_i32 = arith.constant 8 : i32
    %3 = arith.muli %arg1, %c8_i32 : i32
    %4 = tpu.assume_multiple %3, 8 : i32
    %5 = arith.index_cast %4 : i32 to index
    %c0 = arith.constant 0 : index
    %6 = vector.load %arg12[%5, %c0] : memref<8x4xf32, #tpu.memory_space<vmem>>, vector<8x4xf32>
    %c0_1 = arith.constant 0 : index
    %c0_2 = arith.constant 0 : index
    %7 = vector.load %arg13[%c0_1, %c0_2] : memref<4x8xf32, #tpu.memory_space<vmem>>, vector<4x8xf32>
    %c0_i32_3 = arith.constant 0 : i32
    %c0_i32_4 = arith.constant 0 : i32
    %c0_i32_5 = arith.constant 0 : i32
    %8 = tpu.memref_slice %arg9[%c0_i32_3, %c0_i32_4, %c0_i32_5] : memref<4x8x8xbf16, #tpu.memory_space<vmem>> -> memref<1x8x8xbf16, #tpu.memory_space<vmem>>
    %9 = tpu.memref_squeeze %8 : memref<1x8x8xbf16, #tpu.memory_space<vmem>> -> memref<8x8xbf16, #tpu.memory_space<vmem>>
    %10 = arith.index_cast %4 : i32 to index
    %c0_6 = arith.constant 0 : index
    %11 = vector.load %9[%10, %c0_6] : memref<8x8xbf16, #tpu.memory_space<vmem>>, vector<8x8xbf16>
    %c0_7 = arith.constant 0 : index
    %c0_8 = arith.constant 0 : index
    %c0_9 = arith.constant 0 : index
    %12 = vector.load %arg10[%c0_7, %c0_8, %c0_9] : memref<4x8x8xbf16, #tpu.memory_space<vmem>>, vector<1x8x8xbf16>
    %13 = vector.shape_cast %12 : vector<1x8x8xbf16> to vector<8x8xbf16>
    %c0_10 = arith.constant 0 : index
    %c0_11 = arith.constant 0 : index
    %c0_12 = arith.constant 0 : index
    %14 = vector.load %arg11[%c0_10, %c0_11, %c0_12] : memref<4x8x8xbf16, #tpu.memory_space<vmem>>, vector<1x8x8xbf16>
    %15 = vector.shape_cast %14 : vector<1x8x8xbf16> to vector<8x8xbf16>
    %cst = arith.constant dense<0.000000e+00> : vector<8x8xf32>
    %16 = tpu.matmul %11, %13, %cst {dimension_numbers = #tpu.dot_dimension_numbers<[1], [1], [0], [0], [0, 0, 1, 0], [], []>} : vector<8x8xbf16>, vector<8x8xbf16>, vector<8x8xf32> -> vector<8x8xf32>
    %17 = vector.extract_strided_slice %6 {offsets = [0, 0], sizes = [8, 1], strides = [1, 1]} : vector<8x4xf32> to vector<8x1xf32>
    %18 = vector.extract_strided_slice %7 {offsets = [0, 0], sizes = [1, 8], strides = [1, 1]} : vector<4x8xf32> to vector<1x8xf32>
    %19 = vector.broadcast %17 : vector<8x1xf32> to vector<8x8xf32>
    %20 = vector.broadcast %18 : vector<1x8xf32> to vector<8x8xf32>
    %21 = arith.cmpf oeq, %19, %20 : vector<8x8xf32>
    %cst_13 = arith.constant 0xFF800000 : f32
    %22 = vector.broadcast %cst_13 : f32 to vector<8x8xf32>
    %23 = arith.select %21, %16, %22 : vector<8x8xi1>, vector<8x8xf32>
    %cst_14 = arith.constant dense<0xFF800000> : vector<8xf32>
    %24 = vector.multi_reduction <maximumf>, %23, %cst_14 [1] : vector<8x8xf32> to vector<8xf32>
    %25 = vector.shape_cast %24 : vector<8xf32> to vector<8x1xf32>
    %26 = vector.broadcast %25 : vector<8x1xf32> to vector<8x8xf32>
    %27 = arith.subf %23, %26 : vector<8x8xf32>
    %28 = math.exp %27 : vector<8x8xf32>
    %cst_15 = arith.constant dense<0.000000e+00> : vector<8xf32>
    %29 = vector.multi_reduction <add>, %28, %cst_15 [1] : vector<8x8xf32> to vector<8xf32>
    %30 = vector.shape_cast %29 : vector<8xf32> to vector<8x1xf32>
    %31 = tpu.reciprocal %30 {approx = true} : vector<8x1xf32> -> vector<8x1xf32>
    %32 = vector.broadcast %31 : vector<8x1xf32> to vector<8x8xf32>
    %33 = arith.mulf %28, %32 : vector<8x8xf32>
    %34 = arith.truncf %33 : vector<8x8xf32> to vector<8x8xbf16>
    %cst_16 = arith.constant dense<0.000000e+00> : vector<8x8xf32>
    %35 = tpu.matmul %34, %15, %cst_16 {dimension_numbers = #tpu.dot_dimension_numbers<[1], [0], [0], [1], [0, 0, 1, 1], [], []>} : vector<8x8xbf16>, vector<8x8xbf16>, vector<8x8xf32> -> vector<8x8xf32>
    %36 = arith.truncf %35 : vector<8x8xf32> to vector<8x8xbf16>
    %c0_17 = arith.constant 0 : index
    %c0_18 = arith.constant 0 : index
    %37 = vector.load %arg14[%c0_17, %c0_18] : memref<8x32xbf16, #tpu.memory_space<vmem>>, vector<8x8xbf16>
    tpu.vector_store %arg14[%c0_17, %c0_18], %36 {strides = array<i32>} : memref<8x32xbf16, #tpu.memory_space<vmem>>, vector<8x8xbf16>,
    %c1_i32 = arith.constant 1 : i32
    %c0_i32_19 = arith.constant 0 : i32
    %c0_i32_20 = arith.constant 0 : i32
    %38 = tpu.memref_slice %arg9[%c1_i32, %c0_i32_19, %c0_i32_20] : memref<4x8x8xbf16, #tpu.memory_space<vmem>> -> memref<1x8x8xbf16, #tpu.memory_space<vmem>>
    %39 = tpu.memref_squeeze %38 : memref<1x8x8xbf16, #tpu.memory_space<vmem>> -> memref<8x8xbf16, #tpu.memory_space<vmem>>
    %40 = arith.index_cast %4 : i32 to index
    %c0_21 = arith.constant 0 : index
    %41 = vector.load %39[%40, %c0_21] : memref<8x8xbf16, #tpu.memory_space<vmem>>, vector<8x8xbf16>
    %c1 = arith.constant 1 : index
    %c0_22 = arith.constant 0 : index
    %c0_23 = arith.constant 0 : index
    %42 = vector.load %arg10[%c1, %c0_22, %c0_23] : memref<4x8x8xbf16, #tpu.memory_space<vmem>>, vector<1x8x8xbf16>
    %43 = vector.shape_cast %42 : vector<1x8x8xbf16> to vector<8x8xbf16>
    %c1_24 = arith.constant 1 : index
    %c0_25 = arith.constant 0 : index
    %c0_26 = arith.constant 0 : index
    %44 = vector.load %arg11[%c1_24, %c0_25, %c0_26] : memref<4x8x8xbf16, #tpu.memory_space<vmem>>, vector<1x8x8xbf16>
    %45 = vector.shape_cast %44 : vector<1x8x8xbf16> to vector<8x8xbf16>
    %cst_27 = arith.constant dense<0.000000e+00> : vector<8x8xf32>
    %46 = tpu.matmul %41, %43, %cst_27 {dimension_numbers = #tpu.dot_dimension_numbers<[1], [1], [0], [0], [0, 0, 1, 0], [], []>} : vector<8x8xbf16>, vector<8x8xbf16>, vector<8x8xf32> -> vector<8x8xf32>
    %47 = vector.extract_strided_slice %6 {offsets = [0, 1], sizes = [8, 1], strides = [1, 1]} : vector<8x4xf32> to vector<8x1xf32>
    %48 = vector.extract_strided_slice %7 {offsets = [1, 0], sizes = [1, 8], strides = [1, 1]} : vector<4x8xf32> to vector<1x8xf32>
    %49 = vector.broadcast %47 : vector<8x1xf32> to vector<8x8xf32>
    %50 = vector.broadcast %48 : vector<1x8xf32> to vector<8x8xf32>
    %51 = arith.cmpf oeq, %49, %50 : vector<8x8xf32>
    %cst_28 = arith.constant 0xFF800000 : f32
    %52 = vector.broadcast %cst_28 : f32 to vector<8x8xf32>
    %53 = arith.select %51, %46, %52 : vector<8x8xi1>, vector<8x8xf32>
    %cst_29 = arith.constant dense<0xFF800000> : vector<8xf32>
    %54 = vector.multi_reduction <maximumf>, %53, %cst_29 [1] : vector<8x8xf32> to vector<8xf32>
    %55 = vector.shape_cast %54 : vector<8xf32> to vector<8x1xf32>
    %56 = vector.broadcast %55 : vector<8x1xf32> to vector<8x8xf32>
    %57 = arith.subf %53, %56 : vector<8x8xf32>
    %58 = math.exp %57 : vector<8x8xf32>
    %cst_30 = arith.constant dense<0.000000e+00> : vector<8xf32>
    %59 = vector.multi_reduction <add>, %58, %cst_30 [1] : vector<8x8xf32> to vector<8xf32>
    %60 = vector.shape_cast %59 : vector<8xf32> to vector<8x1xf32>
    %61 = tpu.reciprocal %60 {approx = true} : vector<8x1xf32> -> vector<8x1xf32>
    %62 = vector.broadcast %61 : vector<8x1xf32> to vector<8x8xf32>
    %63 = arith.mulf %58, %62 : vector<8x8xf32>
    %64 = arith.truncf %63 : vector<8x8xf32> to vector<8x8xbf16>
    %cst_31 = arith.constant dense<0.000000e+00> : vector<8x8xf32>
    %65 = tpu.matmul %64, %45, %cst_31 {dimension_numbers = #tpu.dot_dimension_numbers<[1], [0], [0], [1], [0, 0, 1, 1], [], []>} : vector<8x8xbf16>, vector<8x8xbf16>, vector<8x8xf32> -> vector<8x8xf32>
    %66 = arith.truncf %65 : vector<8x8xf32> to vector<8x8xbf16>
    %c0_32 = arith.constant 0 : index
    %c8 = arith.constant 8 : index
    %67 = vector.load %arg14[%c0_32, %c8] : memref<8x32xbf16, #tpu.memory_space<vmem>>, vector<8x8xbf16>
    tpu.vector_store %arg14[%c0_32, %c8], %66 {strides = array<i32>} : memref<8x32xbf16, #tpu.memory_space<vmem>>, vector<8x8xbf16>,
    %c2_i32 = arith.constant 2 : i32
    %c0_i32_33 = arith.constant 0 : i32
    %c0_i32_34 = arith.constant 0 : i32
    %68 = tpu.memref_slice %arg9[%c2_i32, %c0_i32_33, %c0_i32_34] : memref<4x8x8xbf16, #tpu.memory_space<vmem>> -> memref<1x8x8xbf16, #tpu.memory_space<vmem>>
    %69 = tpu.memref_squeeze %68 : memref<1x8x8xbf16, #tpu.memory_space<vmem>> -> memref<8x8xbf16, #tpu.memory_space<vmem>>
    %70 = arith.index_cast %4 : i32 to index
    %c0_35 = arith.constant 0 : index
    %71 = vector.load %69[%70, %c0_35] : memref<8x8xbf16, #tpu.memory_space<vmem>>, vector<8x8xbf16>
    %c2 = arith.constant 2 : index
    %c0_36 = arith.constant 0 : index
    %c0_37 = arith.constant 0 : index
    %72 = vector.load %arg10[%c2, %c0_36, %c0_37] : memref<4x8x8xbf16, #tpu.memory_space<vmem>>, vector<1x8x8xbf16>
    %73 = vector.shape_cast %72 : vector<1x8x8xbf16> to vector<8x8xbf16>
    %c2_38 = arith.constant 2 : index
    %c0_39 = arith.constant 0 : index
    %c0_40 = arith.constant 0 : index
    %74 = vector.load %arg11[%c2_38, %c0_39, %c0_40] : memref<4x8x8xbf16, #tpu.memory_space<vmem>>, vector<1x8x8xbf16>
    %75 = vector.shape_cast %74 : vector<1x8x8xbf16> to vector<8x8xbf16>
    %cst_41 = arith.constant dense<0.000000e+00> : vector<8x8xf32>
    %76 = tpu.matmul %71, %73, %cst_41 {dimension_numbers = #tpu.dot_dimension_numbers<[1], [1], [0], [0], [0, 0, 1, 0], [], []>} : vector<8x8xbf16>, vector<8x8xbf16>, vector<8x8xf32> -> vector<8x8xf32>
    %77 = vector.extract_strided_slice %6 {offsets = [0, 2], sizes = [8, 1], strides = [1, 1]} : vector<8x4xf32> to vector<8x1xf32>
    %78 = vector.extract_strided_slice %7 {offsets = [2, 0], sizes = [1, 8], strides = [1, 1]} : vector<4x8xf32> to vector<1x8xf32>
    %79 = vector.broadcast %77 : vector<8x1xf32> to vector<8x8xf32>
    %80 = vector.broadcast %78 : vector<1x8xf32> to vector<8x8xf32>
    %81 = arith.cmpf oeq, %79, %80 : vector<8x8xf32>
    %cst_42 = arith.constant 0xFF800000 : f32
    %82 = vector.broadcast %cst_42 : f32 to vector<8x8xf32>
    %83 = arith.select %81, %76, %82 : vector<8x8xi1>, vector<8x8xf32>
    %cst_43 = arith.constant dense<0xFF800000> : vector<8xf32>
    %84 = vector.multi_reduction <maximumf>, %83, %cst_43 [1] : vector<8x8xf32> to vector<8xf32>
    %85 = vector.shape_cast %84 : vector<8xf32> to vector<8x1xf32>
    %86 = vector.broadcast %85 : vector<8x1xf32> to vector<8x8xf32>
    %87 = arith.subf %83, %86 : vector<8x8xf32>
    %88 = math.exp %87 : vector<8x8xf32>
    %cst_44 = arith.constant dense<0.000000e+00> : vector<8xf32>
    %89 = vector.multi_reduction <add>, %88, %cst_44 [1] : vector<8x8xf32> to vector<8xf32>
    %90 = vector.shape_cast %89 : vector<8xf32> to vector<8x1xf32>
    %91 = tpu.reciprocal %90 {approx = true} : vector<8x1xf32> -> vector<8x1xf32>
    %92 = vector.broadcast %91 : vector<8x1xf32> to vector<8x8xf32>
    %93 = arith.mulf %88, %92 : vector<8x8xf32>
    %94 = arith.truncf %93 : vector<8x8xf32> to vector<8x8xbf16>
    %cst_45 = arith.constant dense<0.000000e+00> : vector<8x8xf32>
    %95 = tpu.matmul %94, %75, %cst_45 {dimension_numbers = #tpu.dot_dimension_numbers<[1], [0], [0], [1], [0, 0, 1, 1], [], []>} : vector<8x8xbf16>, vector<8x8xbf16>, vector<8x8xf32> -> vector<8x8xf32>
    %96 = arith.truncf %95 : vector<8x8xf32> to vector<8x8xbf16>
    %c0_46 = arith.constant 0 : index
    %c16 = arith.constant 16 : index
    %97 = vector.load %arg14[%c0_46, %c16] : memref<8x32xbf16, #tpu.memory_space<vmem>>, vector<8x8xbf16>
    tpu.vector_store %arg14[%c0_46, %c16], %96 {strides = array<i32>} : memref<8x32xbf16, #tpu.memory_space<vmem>>, vector<8x8xbf16>,
    %c3_i32 = arith.constant 3 : i32
    %c0_i32_47 = arith.constant 0 : i32
    %c0_i32_48 = arith.constant 0 : i32
    %98 = tpu.memref_slice %arg9[%c3_i32, %c0_i32_47, %c0_i32_48] : memref<4x8x8xbf16, #tpu.memory_space<vmem>> -> memref<1x8x8xbf16, #tpu.memory_space<vmem>>
    %99 = tpu.memref_squeeze %98 : memref<1x8x8xbf16, #tpu.memory_space<vmem>> -> memref<8x8xbf16, #tpu.memory_space<vmem>>
    %100 = arith.index_cast %4 : i32 to index
    %c0_49 = arith.constant 0 : index
    %101 = vector.load %99[%100, %c0_49] : memref<8x8xbf16, #tpu.memory_space<vmem>>, vector<8x8xbf16>
    %c3 = arith.constant 3 : index
    %c0_50 = arith.constant 0 : index
    %c0_51 = arith.constant 0 : index
    %102 = vector.load %arg10[%c3, %c0_50, %c0_51] : memref<4x8x8xbf16, #tpu.memory_space<vmem>>, vector<1x8x8xbf16>
    %103 = vector.shape_cast %102 : vector<1x8x8xbf16> to vector<8x8xbf16>
    %c3_52 = arith.constant 3 : index
    %c0_53 = arith.constant 0 : index
    %c0_54 = arith.constant 0 : index
    %104 = vector.load %arg11[%c3_52, %c0_53, %c0_54] : memref<4x8x8xbf16, #tpu.memory_space<vmem>>, vector<1x8x8xbf16>
    %105 = vector.shape_cast %104 : vector<1x8x8xbf16> to vector<8x8xbf16>
    %cst_55 = arith.constant dense<0.000000e+00> : vector<8x8xf32>
    %106 = tpu.matmul %101, %103, %cst_55 {dimension_numbers = #tpu.dot_dimension_numbers<[1], [1], [0], [0], [0, 0, 1, 0], [], []>} : vector<8x8xbf16>, vector<8x8xbf16>, vector<8x8xf32> -> vector<8x8xf32>
    %107 = vector.extract_strided_slice %6 {offsets = [0, 3], sizes = [8, 1], strides = [1, 1]} : vector<8x4xf32> to vector<8x1xf32>
    %108 = vector.extract_strided_slice %7 {offsets = [3, 0], sizes = [1, 8], strides = [1, 1]} : vector<4x8xf32> to vector<1x8xf32>
    %109 = vector.broadcast %107 : vector<8x1xf32> to vector<8x8xf32>
    %110 = vector.broadcast %108 : vector<1x8xf32> to vector<8x8xf32>
    %111 = arith.cmpf oeq, %109, %110 : vector<8x8xf32>
    %cst_56 = arith.constant 0xFF800000 : f32
    %112 = vector.broadcast %cst_56 : f32 to vector<8x8xf32>
    %113 = arith.select %111, %106, %112 : vector<8x8xi1>, vector<8x8xf32>
    %cst_57 = arith.constant dense<0xFF800000> : vector<8xf32>
    %114 = vector.multi_reduction <maximumf>, %113, %cst_57 [1] : vector<8x8xf32> to vector<8xf32>
    %115 = vector.shape_cast %114 : vector<8xf32> to vector<8x1xf32>
    %116 = vector.broadcast %115 : vector<8x1xf32> to vector<8x8xf32>
    %117 = arith.subf %113, %116 : vector<8x8xf32>
    %118 = math.exp %117 : vector<8x8xf32>
    %cst_58 = arith.constant dense<0.000000e+00> : vector<8xf32>
    %119 = vector.multi_reduction <add>, %118, %cst_58 [1] : vector<8x8xf32> to vector<8xf32>
    %120 = vector.shape_cast %119 : vector<8xf32> to vector<8x1xf32>
    %121 = tpu.reciprocal %120 {approx = true} : vector<8x1xf32> -> vector<8x1xf32>
    %122 = vector.broadcast %121 : vector<8x1xf32> to vector<8x8xf32>
    %123 = arith.mulf %118, %122 : vector<8x8xf32>
    %124 = arith.truncf %123 : vector<8x8xf32> to vector<8x8xbf16>
    %cst_59 = arith.constant dense<0.000000e+00> : vector<8x8xf32>
    %125 = tpu.matmul %124, %105, %cst_59 {dimension_numbers = #tpu.dot_dimension_numbers<[1], [0], [0], [1], [0, 0, 1, 1], [], []>} : vector<8x8xbf16>, vector<8x8xbf16>, vector<8x8xf32> -> vector<8x8xf32>
    %126 = arith.truncf %125 : vector<8x8xf32> to vector<8x8xbf16>
    %c0_60 = arith.constant 0 : index
    %c24 = arith.constant 24 : index
    %127 = vector.load %arg14[%c0_60, %c24] : memref<8x32xbf16, #tpu.memory_space<vmem>>, vector<8x8xbf16>
    tpu.vector_store %arg14[%c0_60, %c24], %126 {strides = array<i32>} : memref<8x32xbf16, #tpu.memory_space<vmem>>, vector<8x8xbf16>,
    %c0_61 = arith.constant 0 : index
    %c0_62 = arith.constant 0 : index
    %128 = vector.load %arg14[%c0_61, %c0_62] : memref<8x32xbf16, #tpu.memory_space<vmem>>, vector<8x32xbf16>
    %c0_63 = arith.constant 0 : index
    %c0_64 = arith.constant 0 : index
    %129 = vector.load %arg5[%c0_63, %c0_64] : memref<32x32xf32, #tpu.memory_space<vmem>>, vector<32x32xf32>
    %cst_65 = arith.constant dense<0.000000e+00> : vector<8x32xf32>
    %130 = tpu.matmul %128, %129, %cst_65 {dimension_numbers = #tpu.dot_dimension_numbers<[1], [0], [0], [1], [0, 0, 1, 1], [], []>} : vector<8x32xbf16>, vector<32x32xf32>, vector<8x32xf32> -> vector<8x32xf32>
    %c0_66 = arith.constant 0 : index
    %c0_67 = arith.constant 0 : index
    %131 = vector.load %arg6[%c0_66, %c0_67] : memref<1x32xf32, #tpu.memory_space<vmem>>, vector<1x32xf32>
    %132 = vector.broadcast %131 : vector<1x32xf32> to vector<8x32xf32>
    %133 = arith.addf %130, %132 : vector<8x32xf32>
    %c0_68 = arith.constant 0 : index
    %c0_69 = arith.constant 0 : index
    %c0_70 = arith.constant 0 : index
    %134 = vector.load %arg8[%c0_68, %c0_69, %c0_70] : memref<1x8x32xf32, #tpu.memory_space<vmem>>, vector<1x8x32xf32>
    %135 = vector.shape_cast %134 : vector<1x8x32xf32> to vector<8x32xf32>
    %136 = vector.shape_cast %133 : vector<8x32xf32> to vector<1x8x32xf32>
    tpu.vector_store %arg8[%c0_68, %c0_69, %c0_70], %136 {strides = array<i32>} : memref<1x8x32xf32, #tpu.memory_space<vmem>>, vector<1x8x32xf32>,
    return
  }
  func.func @transform_0(%arg0: i32, %arg1: i32) -> (i32, i32, i32) {
    %c0_i32 = arith.constant 0 : i32
    %c0_i32_0 = arith.constant 0 : i32
    %c0_i32_1 = arith.constant 0 : i32
    return %arg0, %c0_i32, %c0_i32_0 : i32, i32, i32
  }
  func.func @transform_1(%arg0: i32, %arg1: i32) -> (i32, i32) {
    %c0_i32 = arith.constant 0 : i32
    %c0_i32_0 = arith.constant 0 : i32
    %c0_i32_1 = arith.constant 0 : i32
    return %c0_i32, %c0_i32_0 : i32, i32
  }
  func.func @transform_2(%arg0: i32, %arg1: i32) -> (i32, i32) {
    %c0_i32 = arith.constant 0 : i32
    %c0_i32_0 = arith.constant 0 : i32
    %c0_i32_1 = arith.constant 0 : i32
    return %c0_i32, %c0_i32_0 : i32, i32
  }
  func.func @transform_3(%arg0: i32, %arg1: i32) -> (i32, i32) {
    %c0_i32 = arith.constant 0 : i32
    %c0_i32_0 = arith.constant 0 : i32
    %c0_i32_1 = arith.constant 0 : i32
    return %c0_i32, %c0_i32_0 : i32, i32
  }
  func.func @transform_4(%arg0: i32, %arg1: i32) -> (i32, i32) {
    %c0_i32 = arith.constant 0 : i32
    %c0_i32_0 = arith.constant 0 : i32
    %c0_i32_1 = arith.constant 0 : i32
    return %c0_i32, %c0_i32_0 : i32, i32
  }
  func.func @transform_5(%arg0: i32, %arg1: i32) -> (i32, i32) {
    %c0_i32 = arith.constant 0 : i32
    %c0_i32_0 = arith.constant 0 : i32
    %c0_i32_1 = arith.constant 0 : i32
    return %c0_i32, %c0_i32_0 : i32, i32
  }
  func.func @transform_6(%arg0: i32, %arg1: i32) -> (i32, i32, i32) {
    %c0_i32 = arith.constant 0 : i32
    %c0_i32_0 = arith.constant 0 : i32
    return %arg0, %arg1, %c0_i32 : i32, i32, i32
  }
}

</mosaic_0001>

<bundles_post_ra>
// kernel: tpu_custom_call.1
= control target key start
LH: loop header
LB: loop body
LE: loop exit
PB: predicated region body
PF: predicated region fallthrough
CT: control target
= control target key end

     0   :  { %s2482_s0 = inlined_call_operand.hbm [shape: f32[2,8,32], index: 0, kind: input, shape index: {}]   ;;  %s2483_s1 = inlined_call_operand.hbm [shape: f32[32,96], index: 1, kind: input, shape index: {}]   ;;  %s2484_s2 = inlined_call_operand.vmem [shape: f32[1,96], index: 2, kind: input, shape index: {}]   ;;  %s2485_s3 = inlined_call_operand.hbm [shape: f32[32,32], index: 3, kind: input, shape index: {}]   ;;  %s2486_s4 = inlined_call_operand.vmem [shape: f32[1,32], index: 4, kind: input, shape index: {}]   ;;  %s2487_s5 = inlined_call_operand.hbm [shape: f32[32,32], index: 5, kind: input, shape index: {}]   ;;  %s2488_s6 = inlined_call_operand.hbm [shape: f32[2,8,32], index: 6, kind: output, shape index: {}]  }
   0x1   :  { %2493 = sst [smem:[#allocation21_spill]] %s2483_s1 }
   0x2   :  { %2494 = sst [smem:[#allocation22_spill]] %s2485_s3 }
   0x3   :  { %11 = vsyncpa [#allocation9], 0 }
   0x4   :  { %13 = vsyncpa [#allocation9 + $0x1], 0 }
   0x5   :  { %14 = vsyncpa [#allocation12], 0 }
   0x6   :  { %15 = vsyncpa [#allocation15], 0 }
   0x7   :  { %16 = vsyncpa [#allocation10], 0 }
   0x8   :  { %18 = vsyncpa [#allocation10 + $0x1], 0  ;;  %s2103_s21 = smov 0   ;;  %s2105_s22 = smov 0  }
   0x9   :  { %s2107_s23 = smov 0   ;;  %s2109_s24 = smov 0  }
   0xa   :  { %s2111_s25 = smov 0   ;;  %s2113_s26 = smov 0  }
   0xb LB: > { %s1531_s27 = sadd.s32 4294967295, %s2039_s26   ;;  %s1532_s28 = sadd.s32 4294967294, %s2039_s26   ;;  %s2039_s26 = sphi %s2113_s26, %s24_s26   ;;  %s2035_s25 = sphi %s2111_s25, %s2514_s25   ;;  %s2031_s24 = sphi %s2109_s24, %s2513_s24   ;;  %s2027_s23 = sphi %s2107_s23, %s2512_s23   ;;  %s2023_s22 = sphi %s2105_s22, %s2511_s22   ;;  %s2019_s21 = sphi %s2103_s21, %s2510_s21  }
   0xc   : > { %p56_p0 = scmp.ne.s32.totalorder %s2023_s22, %s2019_s21  ;;  %p2137_p1 = scmp.eq.s32.totalorder %s1531_s27, 0 }
   0xd   : > { %p2141_p2 = scmp.eq.s32.totalorder %s1531_s27, 1  ;;  %p193_p3 = scmp.eq.s32.totalorder %s1532_s28, 1 }
   0xe   : > { %s2495_s29 = scalar_select %p2137_p1, 1, 0 }
   0xf   : > { %p2147_p4 = por %p2137_p1, %p56_p0  ;;  %p1533_p5 = scmp.ge.s32.totalorder %s2039_s26, 1 }
  0x10   : > { %p2152_p6 = por %p193_p3, %p56_p0  ;;  %p200_p7 = scmp.lt.s32.totalorder %s2039_s26, 3 }
  0x11   : > { %s2497_s7 = scalar_select %p2147_p4, 1, 0 }
  0x12   : > { %s2498_s8 = scalar_select %p2152_p6, 1, 0 }
  0x13   : > { %p2157_p8 = pnand %p1533_p5, %p200_p7  ;;  %s2041_s10 = smov [#allocation11]  }
  0x14   : > { %s212_s11 = sshll.u32 %s2041_s10, 4  ;;  %s2042_s13 = smov [#allocation13]   ;;  %s213_s11 = int_to_ptr.vmem [resolvable:$true] %s212_s11 }
  0x15   : > { %s2499_s9 = scalar_select %p2157_p8, 1, 0 }
  0x16   : > { %p1725_p9 = pneg %p2157_p8  ;;  %s228_s14 = sshll.u32 %s2042_s13, 4  ;;  %s229_s14 = int_to_ptr.vmem [resolvable:$true] %s228_s14 }
  0x17   : > { %s2043_s15 = smov [#allocation14]   ;;  %s1856_s17 = scalar_lea.vmem %s213_s11, 512 }
  0x18   : > { %p2166_p11 = pnand %p1725_p9, %p2137_p1  ;;  %s244_s16 = sshll.u32 %s2043_s15, 4  ;;  %s245_s16 = int_to_ptr.vmem [resolvable:$true] %s244_s16 }
  0x19   : > { %p1857_p13 = scmp.ne.s32.totalorder %s213_s11, %s1856_s17  ;;  %p1864_p5 = scmp.lt.s32.totalorder %s213_s11, %s213_s11 }
  0x1a   : > { %p1847_p12 = pneg %p2166_p11  ;;  %p1865_p7 = scmp.lt.s32.totalorder %s1856_s17, %s1856_s17 }
  0x1c   : > { %p1859_p0 = pnand %p1857_p13, %p1847_p12  ;;  %p1866_p9 = por %p1865_p7, %p1864_p5 }
  0x1e   : > { %p1860_p3 = pneg %p1859_p0 }
  0x20   : > { %p1867_p10 = pnand %p1866_p9, %p1860_p3 }
  0x22   : > { %1870 = shalt.err (!%p1867_p10)
}
  0x23   : > { %s2044_s18 = smov 128   ;;  %s2045_s19 = smov 8  }
  0x24   : > { %s2501_s1 = sld [smem:[#allocation21_spill]]  ;;  %s1882_s28 = scalar_lea.vmem %s229_s14, 512 }
  0x25   : > { %p1883_p6 = scmp.ne.s32.totalorder %s229_s14, %s1882_s28  ;;  %p1890_p1 = scmp.lt.s32.totalorder %s229_s14, %s229_s14 }
  0x26   : > { %p1891_p4 = scmp.lt.s32.totalorder %s1882_s28, %s1882_s28 }
  0x27   : > { %p1885_p13 = pnand %p1883_p6, %p1847_p12 }
  0x28   : > { %p1892_p5 = por %p1891_p4, %p1890_p1 }
  0x29   : > { %p1886_p0 = pneg %p1885_p13 }
  0x2a   : > { %1728 = dma.hbm_to_vmem [thread:$0]  (!%p2166_p11), %s2501_s1, 512, %s213_s11, [#allocation12], %s2044_s18, %s2044_s18, %s2045_s19  }
  0x2b   : > { %p1893_p3 = pnand %p1892_p5, %p1886_p0 }
  0x2d   : > { %1896 = shalt.err (!%p1893_p3)
}
  0x2e   : > { %s2502_s3 = sld [smem:[#allocation22_spill]]  ;;  %s1908_s11 = scalar_lea.vmem %s245_s16, 512 }
  0x2f   : > { %p1909_p10 = scmp.ne.s32.totalorder %s245_s16, %s1908_s11  ;;  %p1916_p9 = scmp.lt.s32.totalorder %s245_s16, %s245_s16 }
  0x30   : > { %p1917_p13 = scmp.lt.s32.totalorder %s1908_s11, %s1908_s11 }
  0x31   : > { %p1911_p7 = pnand %p1909_p10, %p1847_p12 }
  0x32   : > { %p1918_p8 = por %p1917_p13, %p1916_p9 }
  0x33   : > { %p1912_p6 = pneg %p1911_p7 }
  0x34   : > { %1731 = dma.hbm_to_vmem [thread:$0]  (!%p2166_p11), %s2502_s3, 512, %s229_s14, [#allocation12], %s2044_s18, %s2044_s18, %s2045_s19  }
  0x35   : > { %p1919_p1 = pnand %p1918_p8, %p1912_p6 }
  0x37   : > { %1922 = shalt.err (!%p1919_p1)
}
  0x38   : > { %1734 = dma.hbm_to_vmem [thread:$0]  (!%p2166_p11), %s2487_s5, 512, %s245_s16, [#allocation15], %s2044_s18, %s2044_s18, %s2045_s19  }
  0x39   : > { %s43_s14 = sadd.s32 1, %s2027_s23  ;;  %s36_s20 = sadd.s32 1, %s2035_s25 }
  0x3a   : > { %p50_p4 = scmp.ne.s32.totalorder %s2027_s23, %s2023_s22  ;;  %p38_p8 = scmp.ge.s32.totalorder %s36_s20, 2 }
  0x3b   : > { %p51_p12 = scmp.eq.s32.totalorder %s2039_s26, 0  ;;  %p1746_p5 = scmp.lt.s32.totalorder %s2039_s26, 2 }
  0x3c   : > { %p2203_p0 = por %p2141_p2, %p50_p4  ;;  %s2516_s20 = smov (%p38_p8, %s36_s20), 0 }
  0x3d   : > { %p52_p3 = por %p51_p12, %p50_p4  ;;  %s258_s27 = sand.u32 1, %s2027_s23  }
  0x3e   : > { %s40_s28 = ssub.s32 %s2035_s25, %s2516_s20  ;;  %s1538_s16 = sshll.u32 %s258_s27, 3 }
  0x3f   : > { %p41_p10 = scmp.eq.s32.totalorder %s40_s28, 0  ;;  %s1539_s18 = sshll.u32 %s2035_s25, 7 }
  0x40   : > { %s267_s30 = scalar_lea.hbm %s2482_s0, %s1539_s18  ;;  %s262_s11 = scalar_lea.vmem [#allocation8], %s1538_s16 }
  0x41   : > { %s2215_s19 = scalar_select %p41_p10, %s2027_s23, %s43_s14  }
  0x42   : > { %s269_s15 = sshll.u32 %s262_s11, 4  ;;  %p2222_p2 = pnand %p1746_p5, %p52_p3  ;;  %s270_s15 = int_to_ptr.vmem [resolvable:$true] %s269_s15 }
  0x43   : > { %s259_s1 = scalar_lea.sflag [#allocation9], %s258_s27  ;;  %s1936_s28 = scalar_lea.vmem %s270_s15, 128 }
  0x44   : > { %p1925_p11 = pneg %p2222_p2  ;;  %p1937_p7 = scmp.ne.s32.totalorder %s270_s15, %s1936_s28 }
  0x45   : > { %s2046_s14 = smov [#allocation8]  }
  0x46   : > { %p1939_p6 = pnand %p1937_p7, %p1925_p11  ;;  %s1941_s3 = sshll.u32 %s2046_s14, 4  ;;  %s1942_s3 = int_to_ptr.vmem [resolvable:$false] %s1941_s3 }
  0x47   : > { %s1943_s18 = scalar_lea.vmem %s1942_s3, 256  ;;  %p1944_p13 = scmp.lt.s32.totalorder %s270_s15, %s1942_s3 }
  0x48   : > { %p1940_p9 = pneg %p1939_p6  ;;  %p1945_p1 = scmp.lt.s32.totalorder %s1943_s18, %s1936_s28 }
  0x4a   : > { %p1946_p4 = por %p1945_p1, %p1944_p13 }
  0x4c   : > { %p1947_p8 = pnand %p1946_p4, %p1940_p9 }
  0x4e   : > { %1950 = shalt.err (!%p1947_p8)
}
  0x4f   : > { %1738 = dma.hbm_to_vmem [thread:$0]  (!%p2222_p2), %s267_s30, 128, %s270_s15, %s259_s1  }
  0x50   : > { %p2505_p12 = scmp.ne.s32.totalorder %s2499_s9, 0 }
  0x51   : > { %s2233_s27 = sand.u32 (!%p2505_p12), 1, %s2023_s22   ;;  %p2506_p5 = scmp.ne.s32.totalorder (!%p2505_p12), %s2497_s7, 0 }
  0x52   : > { %278 = sbr.rel (%p2505_p12) target bundleno = 1782 (0x6f6), region = 44  ;;  %s1541_s16 = sshll.u32 (!%p2505_p12), %s2233_s27, 3 }
  0x53   : > { %s281_s10 = scalar_lea.sflag (!%p2505_p12), [#allocation9], %s2233_s27  ;;  %s284_s3 = scalar_lea.vmem (!%p2505_p12), [#allocation8], %s1541_s16 }
  0x57   : > { %2002 = dma.done.wait (%p2506_p5), %s281_s10, 128  }
  0x58   : > { %2004 = vsyncadd (%p2506_p5), %s281_s10, 4294967168  ;;  %p2507_p3 = scmp.ne.s32.totalorder %s2495_s29, 0 }
  0x5a   : > { %2006 = dma.done.wait (%p2507_p3), [#allocation12], 1024  }
  0x5b   : > { %2008 = vsyncadd (%p2507_p3), [#allocation12], 4294966272 }
  0x5c   : > { %2010 = dma.done.wait (%p2507_p3), [#allocation15], 512  }
  0x5d   : > { %2012 = vsyncadd (%p2507_p3), [#allocation15], 4294966784  ;;  %v2047_v0 = vmov 0.0   ;;  %vm2048_vm0 = vmmov 0   ;;  %v334_v1 = vld [vmem:[#allocation11 + $0x18] sm:$0xff]  ;;  %v333_v2 = vld [vmem:[#allocation11 + $0x10] sm:$0xff]  ;;  %v594_v9 = vlaneseq }
  0x5e   : > { %1619 = vmatprep.subr.mxu0 %v2047_v0  ;;  %1627 = vmatprep.mubr.msk.f32.mxu0 %vm2048_vm0, %v2047_v0  ;;  %vm342_vm1 = vcmask 261120   ;;  %v2257_v3 = vld [vmem:[#allocation14 + $0x18] sm:$0xff]  ;;  %v332_v4 = vld [vmem:[#allocation11 + $0x8] sm:$0xff]  ;;  %v418_v5 = vld [vmem:[#allocation14 + $0x10] sm:$0xff]  ;;  %s2049_s1 = smov 8   ;;  %vm630_vm2 = vcmask 60416  }
  0x5f   : > { %1630 = vmatprep.subr.mxu1 %v2047_v0  ;;  %1638 = vmatprep.mubr.msk.f32.mxu1 %vm2048_vm0, %v2047_v0  ;;  %v331_v6 = vld [vmem:[#allocation11] sm:$0xff]  ;;  %v330_v7 = vld [vmem:[%s284_s3] sm:$0xff]  ;;  %v417_v8 = vld [vmem:[#allocation14 + $0x8] sm:$0xff]  ;;  %v595_v10 = vand.u32 127, %v594_v9  ;;  %s2050_s9 = smov 96   ;;  %s2051_s13 = smov 88  }
  0x60   : > { %1620 = vmatpush3.msra.mxu0 %v334_v1  ;;  %1631 = vmatpush3.xpose.msk.msra.mxu1 %vm342_vm1, %v2257_v3  ;;  %v416_v11 = vld [vmem:[#allocation14] sm:$0xff]  ;;  %v1546_v13 = vld [vmem:[%s2484_s2] ss:$0 sm:$0xff]  ;;  %s2052_s30 = smov 120   ;;  %s2053_s11 = smov 80   ;;  %vm600_vm3 = vcmask 64512  }
  0x61   : > { %1621 = vmatprep.subr.mxu0 %v2047_v0  ;;  %1632 = vmatprep.subr.mxu1 %v2047_v0  ;;  %v2271_v12 = vcvt.s32.f32 %v595_v10  ;;  %s2054_s15 = smov 112   ;;  %s2055_s17 = smov 72   ;;  %vm643_vm4 = vcmask 130112   ;;  %vm690_vm5 = vcmask 195712   ;;  %vm736_vm6 = vcmask 261312  }
  0x62   : > { %1622 = vmatpush3.msra.mxu0 %v333_v2  ;;  %s2056_s28 = smov 104   ;;  %s2057_s14 = smov 24   ;;  %v2351_v58 = vshrl.u32 %v594_v9, 7  ;;  %vm627_vm13 = vcmask 57344  }
  0x63   : > { %1623 = vmatprep.subr.mxu0 %v2047_v0  ;;  %649 = vrot.lane.b32.xlu1 %v2271_v12, %s2049_s1  ;;  %s2058_s18 = smov 16   ;;  %s2063_s10 = smov 64  }
  0x64   : > { %1624 = vmatpush3.msra.mxu0 %v332_v4  ;;  %1633 = vmatpush3.xpose.msk.msra.mxu1 %vm342_vm1, %v418_v5  ;;  %s2064_s3 = smov 48   ;;  %s2065_s29 = smov 40  }
  0x65   : > { %1625 = vmatprep.subr.mxu0 %v2047_v0  ;;  %1634 = vmatprep.subr.mxu1 %v2047_v0  ;;  %s2066_s7 = smov 56  }
  0x66   : > { %1626 = vmatpush3.msra.mxu0 %v331_v6 }
  0x67   : > { %1628 = vmatmul.mubr.msk.f32.vlgmr.msra.gmra.mxu0 %vm342_vm1, %v330_v7 }
  0x68   : > { %1635 = vmatpush3.xpose.msk.msra.mxu1 %vm342_vm1, %v417_v8  ;;  %1643 = vmatprep.mubr.msk.f32.mxu0 %vm342_vm1, %v416_v11 }
  0x69   : > { %1636 = vmatprep.subr.mxu1 %v2047_v0 }
  0x6c   : > { %1637 = vmatpush3.xpose.msk.msra.mxu1 %vm342_vm1, %v416_v11 }
  0x6d   : > { %1655 = vmatprep.subr.bf16.mxu1 %v2047_v0 }
  0xd5   : > { %v2295_v18 = vpop.permute.xlu1 %649 }
 0x127   : > { %v412_v14 = vpop.f32.mrf.mxu0 }
 0x128   : > { %v413_v15 = vadd.f32 %v1546_v13, %v412_v14 }
 0x129   : > { %v1629_v16 = vpop.f32.mrf.mxu0 }
 0x12a   : > { %v2281_v17 = vpack.c.bf16 %v413_v15, %v413_v15  ;;  %505 = vrot.lane.b32.xlu0 %v413_v15, %s2050_s9  ;;  %1639 = vmatmul.mubr.msk.f32.vlgmr.msra.gmra.mxu1 %vm342_vm1, %v413_v15 }
 0x12b   : > { %1657 = vmatprep.mubr.msk.bf16.mxu1 %vm2048_vm0, %v2047_v0 }
 0x12c   : > { %680 = vrot.lane.b32.xlu1 %v2281_v17, %s2051_s13  ;;  %631 = vst.msk [vmem:[#allocation2] sm:$0xf] %vm630_vm2, %v2281_v17  ;;  %s1576_s13 = sshll.u32 %s2031_s24, 7  ;;  %s1396_s24 = scalar_lea.sflag [#allocation10], %s2233_s27 }
 0x12e   : > { %635 = vrot.lane.b32.xlu0 %v2281_v17, %s2050_s9 }
 0x130   : > { %675 = vrot.lane.b32.xlu1 %v2281_v17, %s2052_s30  ;;  %s324_s30 = scalar_lea.vmem [#allocation16], %s1541_s16  ;;  %s2067_s16 = smov [#allocation16]  }
 0x132   : > { %726 = vrot.lane.b32.xlu0 %v2281_v17, %s2053_s11  ;;  %s1410_s11 = sshll.u32 %s324_s30, 4  ;;  %s2435_s11 = int_to_ptr.vmem [resolvable:$true] %s1410_s11 }
 0x133   : > { %v790_v30 = vld [vmem:[#allocation2] sm:$0xf] }
 0x134   : > { %721 = vrot.lane.b32.xlu1 %v2281_v17, %s2054_s15 }
 0x136   : > { %772 = vrot.lane.b32.xlu0 %v2281_v17, %s2055_s17 }
 0x138   : > { %767 = vrot.lane.b32.xlu1 %v2281_v17, %s2056_s28  ;;  %s2433_s28 = scalar_lea.hbm %s2488_s6, %s1576_s13 }
 0x19c   : > { %v506_v19 = vpop.permute.xlu0 %505 }
 0x19d   : > { %1641 = vmatprep.subr.msk.mxu0 %vm342_vm1, %v506_v19 }
 0x19e   : > { %1642 = vmatpush3.xpose.msk.msra.mxu0 %vm342_vm1, %v506_v19  ;;  %v681_v20 = vpop.permute.xlu1 %680 }
 0x19f   : > { %684 = vst.msk [vmem:[#allocation3 + $0x4] sm:$0xf] %vm630_vm2, %v681_v20  ;;  %1649 = vmatprep.subr.bf16.mxu0 %v2047_v0 }
 0x1a0   : > { %v636_v21 = vpop.permute.xlu0 %635 }
 0x1a1   : > { %638 = vst.msk [vmem:[#allocation3] sm:$0xf] %vm630_vm2, %v636_v21  ;;  %1644 = vmatmul.mubr.msk.f32.vlgmr.msra.gmra.mxu0 %vm342_vm1, %v417_v8 }
 0x1a2   : > { %v676_v22 = vpop.permute.xlu1 %675  ;;  %1646 = vmatprep.mubr.msk.f32.mxu0 %vm342_vm1, %v418_v5  ;;  %v599_v5 = vcvt.s32.f32 %v2351_v58 }
 0x1a3   : > { %679 = vst.msk [vmem:[#allocation2 + $0x4] sm:$0xf] %vm630_vm2, %v676_v22 }
 0x1a4   : > { %v727_v23 = vpop.permute.xlu0 %726 }
 0x1a5   : > { %730 = vst.msk [vmem:[#allocation3 + $0x8] sm:$0xf] %vm630_vm2, %v727_v23  ;;  %1647 = vmatmul.mubr.msk.f32.gmra.mxu0 %vm342_vm1, %v2257_v3 }
 0x1a6   : > { %v722_v24 = vpop.permute.xlu1 %721  ;;  %1651 = vmatprep.mubr.msk.bf16.mxu0 %vm2048_vm0, %v2047_v0  ;;  %v918_v29 = vld [vmem:[#allocation3 + $0x4] sm:$0xf] }
 0x1a7   : > { %725 = vst.msk [vmem:[#allocation2 + $0x8] sm:$0xf] %vm630_vm2, %v722_v24  ;;  %v925_v31 = vsel %vm600_vm3, %v918_v29, 0 }
 0x1a8   : > { %v773_v25 = vpop.permute.xlu0 %772  ;;  %v791_v26 = vld [vmem:[#allocation3] sm:$0xf] }
 0x1a9   : > { %776 = vst.msk [vmem:[#allocation3 + $0xc] sm:$0xf] %vm630_vm2, %v773_v25  ;;  %v798_v27 = vsel %vm600_vm3, %v791_v26, 0 }
 0x1aa   : > { %v768_v28 = vpop.permute.xlu1 %767  ;;  %1650 = vmatpush3.bf16.xpose.msra.mxu0 %v798_v27  ;;  %v1561_v33 = vld [vmem:[#allocation2 + $0x4] sm:$0xf] }
 0x1ab   : > { %771 = vst.msk [vmem:[#allocation2 + $0xc] sm:$0xf] %vm630_vm2, %v768_v28  ;;  %1661 = vmatprep.subr.bf16.mxu0 %v2047_v0 }
 0x1ac   : > { %v1049_v32 = vld [vmem:[#allocation3 + $0x8] sm:$0xf] }
 0x1ad   : > { %v1056_v34 = vsel %vm600_vm3, %v1049_v32, 0 }
 0x1ae   : > { %v1565_v36 = vld [vmem:[#allocation2 + $0x8] sm:$0xf] }
 0x1b0   : > { %v1180_v35 = vld [vmem:[#allocation3 + $0xc] sm:$0xf] }
 0x1b1   : > { %1652 = vmatmul.mubr.msk.bf16.vlgmr.msra.gmra.mxu0 %vm600_vm3, %v790_v30  ;;  %v1187_v37 = vsel %vm600_vm3, %v1180_v35, 0 }
 0x1b2   : > { %1662 = vmatpush3.bf16.xpose.msra.mxu0 %v925_v31  ;;  %1663 = vmatprep.mubr.msk.bf16.mxu0 %vm2048_vm0, %v2047_v0  ;;  %v1569_v38 = vld [vmem:[#allocation2 + $0xc] sm:$0xf] }
 0x1b3   : > { %1673 = vmatprep.subr.bf16.mxu0 %v2047_v0 }
 0x1b9   : > { %1664 = vmatmul.mubr.msk.bf16.vlgmr.msra.gmra.mxu0 %vm600_vm3, %v1561_v33 }
 0x1ba   : > { %1674 = vmatpush3.bf16.xpose.msra.mxu0 %v1056_v34  ;;  %1675 = vmatprep.mubr.msk.bf16.mxu0 %vm2048_vm0, %v2047_v0 }
 0x1bb   : > { %1685 = vmatprep.subr.bf16.mxu0 %v2047_v0 }
 0x1c1   : > { %1676 = vmatmul.mubr.msk.bf16.vlgmr.msra.gmra.mxu0 %vm600_vm3, %v1565_v36 }
 0x1c2   : > { %1686 = vmatpush3.bf16.xpose.msra.mxu0 %v1187_v37  ;;  %1687 = vmatprep.mubr.msk.bf16.mxu0 %vm2048_vm0, %v2047_v0 }
 0x1c3   : > { %1697 = vmatprep.subr.mxu0 %v2047_v0 }
 0x1c9   : > { %1688 = vmatmul.mubr.msk.bf16.vlgmr.msra.gmra.mxu0 %vm600_vm3, %v1569_v38 }
 0x1ca   : > { %1705 = vmatprep.mubr.msk.bf16.mxu0 %vm2048_vm0, %v2047_v0 }
 0x1ea   : > { %v2333_v39 = vpop.f32.mrf.mxu1 }
 0x1eb   : > { %v644_v40 = vsel %vm643_vm4, %v2333_v39, -inf  ;;  %v601_v41 = vsel %vm600_vm3, %v2333_v39, -inf  ;;  %v691_v43 = vsel %vm690_vm5, %v2333_v39, -inf  ;;  %v737_v44 = vsel %vm736_vm6, %v2333_v39, -inf }
 0x1ec   : > { %645 = vmax.xlane.f32.xlu1 %v644_v40  ;;  %602 = vmax.xlane.f32.xlu0 %v601_v41  ;;  %v1640_v42 = vpop.f32.mrf.mxu1 }
 0x1f0   : > { %692 = vmax.xlane.f32.xlu0 %v691_v43 }
 0x1f4   : > { %738 = vmax.xlane.f32.xlu0 %v737_v44 }
 0x1fd   : > { %741 = vrot.lane.b32.xlu1 %v2271_v12, %s2057_s14 }
 0x20a   : > { %695 = vrot.lane.b32.xlu0 %v2271_v12, %s2058_s18 }
 0x261   : > { %v1645_v45 = vpop.f32.mrf.mxu0 }
 0x262   : > { %v658_v46 = vsel %vm600_vm3, %v1645_v45, -inf }
 0x263   : > { %v659_v47 = vrot.slane %v658_v46, 4  ;;  %v575_v48 = vpop.f32.mrf.mxu0 }
 0x264   : > { %v611_v49 = vsel %vm600_vm3, %v575_v48, -inf }
 0x265   : > { %v660_v50 = vmax.f32 %v658_v46, %v659_v47  ;;  %v612_v51 = vrot.slane %v611_v49, 4  ;;  %v1648_v52 = vpop.f32.mrf.mxu0 }
 0x266   : > { %v750_v53 = vsel %vm600_vm3, %v1648_v52, -inf }
 0x267   : > { %v661_v54 = vrot.slane %v660_v50, 2  ;;  %v613_v55 = vmax.f32 %v611_v49, %v612_v51  ;;  %v751_v56 = vrot.slane %v750_v53, 4  ;;  %v585_v57 = vpop.f32.mrf.mxu0 }
 0x268   : > { %v704_v59 = vsel %vm600_vm3, %v585_v57, -inf }
 0x269   : > { %v662_v60 = vmax.f32 %v660_v50, %v661_v54  ;;  %v614_v61 = vrot.slane %v613_v55, 2  ;;  %v752_v62 = vmax.f32 %v750_v53, %v751_v56  ;;  %v705_v63 = vrot.slane %v704_v59, 4 }
 0x26b   : > { %v663_v1 = vrot.slane %v662_v60, 1  ;;  %v615_v2 = vmax.f32 %v613_v55, %v614_v61  ;;  %v753_v3 = vrot.slane %v752_v62, 2  ;;  %v706_v4 = vmax.f32 %v704_v59, %v705_v63 }
 0x26d   : > { %v664_v6 = vmax.f32 %v662_v60, %v663_v1  ;;  %v616_v7 = vrot.slane %v615_v2, 1  ;;  %v754_v8 = vmax.f32 %v752_v62, %v753_v3  ;;  %v707_v10 = vrot.slane %v706_v4, 2 }
 0x26f   : > { %vm665_vm7 = vcmp.eq.f32.partialorder %v1645_v45, %v664_v6  ;;  %v617_v11 = vmax.f32 %v615_v2, %v616_v7  ;;  %v755_v9 = vrot.slane %v754_v8, 1  ;;  %v708_v13 = vmax.f32 %v706_v4, %v707_v10 }
 0x270   : > { %v666_v14 = vsel %vm665_vm7, %v599_v5, 8.0  ;;  %vm748_vm7 = vcmask 31768  }
 0x271   : > { %v667_v15 = vsel %vm600_vm3, %v666_v14, inf  ;;  %vm618_vm8 = vcmp.eq.f32.partialorder %v575_v48, %v617_v11  ;;  %v756_v16 = vmax.f32 %v754_v8, %v755_v9  ;;  %v709_v19 = vrot.slane %v708_v13, 1  ;;  %v2356_v20 = vpop.f32.mrf.mxu0 }
 0x272   : > { %v668_v21 = vrot.slane %v667_v15, 4  ;;  %v619_v22 = vsel %vm618_vm8, %v599_v5, 8.0 }
 0x273   : > { %v620_v23 = vsel %vm600_vm3, %v619_v22, inf  ;;  %vm757_vm9 = vcmp.eq.f32.partialorder %v1648_v52, %v756_v16  ;;  %v710_v24 = vmax.f32 %v708_v13, %v709_v19  ;;  %v1653_v25 = vpop.f32.mrf.mxu0  ;;  %v2060_v22 = vmov 0  }
 0x274   : > { %v669_v26 = vmin.f32 %v667_v15, %v668_v21  ;;  %v621_v27 = vrot.slane %v620_v23, 4  ;;  %v758_v28 = vsel %vm757_vm9, %v599_v5, 8.0  ;;  %1824 = vset.pattern.permute.xlu0 %v2060_v22 }
 0x275   : > { %v759_v29 = vsel %vm600_vm3, %v758_v28, inf  ;;  %vm711_vm10 = vcmp.eq.f32.partialorder %v585_v57, %v710_v24  ;;  %v646_v30 = vpop.xlane.xlu1 %645  ;;  %v603_v31 = vpop.xlane.xlu0 %602  ;;  %v2061_v28 = vmov 2  }
 0x276   : > { %v670_v32 = vrot.slane %v669_v26, 2  ;;  %v622_v33 = vmin.f32 %v620_v23, %v621_v27  ;;  %v760_v34 = vrot.slane %v759_v29, 4  ;;  %v712_v35 = vsel %vm711_vm10, %v599_v5, 8.0  ;;  %v837_v36 = vpop.f32.mrf.mxu0 }
 0x277   : > { %v713_v37 = vsel %vm600_vm3, %v712_v35, inf  ;;  %vm647_vm11 = vcmp.eq.f32.partialorder %v2333_v39, %v646_v30  ;;  %vm604_vm12 = vcmp.eq.f32.partialorder %v2333_v39, %v603_v31  ;;  %v973_v30 = vsub.s32 1, %v2351_v58 }
 0x278   : > { %v671_v38 = vmin.f32 %v669_v26, %v670_v32  ;;  %v623_v40 = vrot.slane %v622_v33, 2  ;;  %v761_v41 = vmin.f32 %v759_v29, %v760_v34  ;;  %v714_v42 = vrot.slane %v713_v37, 4  ;;  %v1654_v43 = vpop.f32.mrf.mxu0 }
 0x279   : > { %v652_v44 = vsel %vm647_vm11, %v2295_v18, 8.0  ;;  %v605_v45 = vsel %vm604_vm12, %v2271_v12, 8.0  ;;  %v693_v46 = vpop.xlane.xlu0 %692  ;;  %v742_v12 = vpop.permute.xlu1 %741  ;;  %v2062_v29 = vmov 3   ;;  %v847_v31 = vsub.s32 0, %v2351_v58 }
 0x27a   : > { %v672_v47 = vrot.slane %v671_v38, 1  ;;  %v624_v48 = vmin.f32 %v622_v33, %v623_v40  ;;  %v762_v49 = vrot.slane %v761_v41, 2  ;;  %v715_v50 = vmin.f32 %v713_v37, %v714_v42  ;;  %v2365_v51 = vpop.f32.mrf.mxu0 }
 0x27b   : > { %v653_v52 = vsel %vm643_vm4, %v652_v44, inf  ;;  %v606_v53 = vsel %vm600_vm3, %v605_v45, inf  ;;  %vm694_vm15 = vcmp.eq.f32.partialorder %v2333_v39, %v693_v46  ;;  %vm609_vm4 = vcmask 7168  }
 0x27c   : > { %v673_v54 = vmin.f32 %v671_v38, %v672_v47  ;;  %v625_v55 = vrot.slane %v624_v48, 1  ;;  %v763_v56 = vmin.f32 %v761_v41, %v762_v49  ;;  %v716_v57 = vrot.slane %v715_v50, 2  ;;  %654 = vmin.xlane.f32.xlu0 %v653_v52  ;;  %607 = vmin.xlane.f32.xlu1 %v606_v53  ;;  %v1665_v18 = vpop.f32.mrf.mxu0 }
 0x27d   : > { %v739_v59 = vpop.xlane.xlu0 %738  ;;  %v1104_v37 = vsub.s32 2, %v2351_v58  ;;  %v1235_v45 = vsub.s32 3, %v2351_v58  ;;  %vm866_vm12 = vcmask 1043456  }
 0x27e   : > { %674 = vst.msk [vmem:[#allocation6 + $0x1] sm:$0x1] %vm627_vm13, %v673_v54  ;;  %v626_v60 = vmin.f32 %v624_v48, %v625_v55  ;;  %v764_v61 = vrot.slane %v763_v56, 1  ;;  %v717_v62 = vmin.f32 %v715_v50, %v716_v57  ;;  %vm740_vm14 = vcmp.eq.f32.partialorder %v2333_v39, %v739_v59  ;;  %v964_v63 = vpop.f32.mrf.mxu0 }
 0x27f   : > { %v744_v1 = vsel %vm740_vm14, %v742_v12, 8.0  ;;  %v2059_v39 = vmov 1  }
 0x280   : > { %628 = vst.msk [vmem:[#allocation6] sm:$0x1] %vm627_vm13, %v626_v60  ;;  %v765_v2 = vmin.f32 %v763_v56, %v764_v61  ;;  %v718_v3 = vrot.slane %v717_v62, 1  ;;  %v1666_v4 = vpop.f32.mrf.mxu0  ;;  %v745_v5 = vsel %vm736_vm6, %v744_v1, inf  ;;  %1825 = vset.pattern.permute.xlu1 %v2059_v39  ;;  %vm656_vm6 = vcmask 15368  }
 0x281   : > { %746 = vmin.xlane.f32.xlu1 %v745_v5  ;;  %v696_v6 = vpop.permute.xlu0 %695 }
 0x282   : > { %766 = vst.msk [vmem:[#allocation6 + $0x3] sm:$0x1] %vm627_vm13, %v765_v2  ;;  %v719_v7 = vmin.f32 %v717_v62, %v718_v3  ;;  %v698_v8 = vsel %vm694_vm15, %v696_v6, 8.0  ;;  %v1092_v10 = vpop.f32.mrf.mxu0 }
 0x283   : > { %v699_v11 = vsel %vm690_vm5, %v698_v8, inf  ;;  %vm702_vm5 = vcmask 23568  }
 0x284   : > { %720 = vst.msk [vmem:[#allocation6 + $0x2] sm:$0x1] %vm627_vm13, %v719_v7  ;;  %v1677_v9 = vpop.f32.mrf.mxu0  ;;  %700 = vmin.xlane.f32.xlu0 %v699_v11 }
 0x286   : > { %v1095_v13 = vpop.f32.mrf.mxu0 }
 0x288   : > { %v1678_v14 = vpop.f32.mrf.mxu0 }
 0x28a   : > { %v1223_v15 = vpop.f32.mrf.mxu0 }
 0x28b   : > { %v785_v32 = vld [vmem:[#allocation6] sm:$0xf] }
 0x28c   : > { %v1689_v16 = vpop.f32.mrf.mxu0  ;;  %v974_v33 = vrot.slane %v785_v32, %v973_v30  ;;  %v848_v34 = vrot.slane %v785_v32, %v847_v31  ;;  %v1105_v43 = vrot.slane %v785_v32, %v1104_v37  ;;  %v1236_v48 = vrot.slane %v785_v32, %v1235_v45 }
 0x28e   : > { %v1226_v19 = vpop.f32.mrf.mxu0 }
 0x290   : > { %v1690_v21 = vpop.f32.mrf.mxu0 }
 0x305   : > { %v608_v23 = vpop.xlane.xlu1 %607  ;;  %v655_v24 = vpop.xlane.xlu0 %654 }
 0x306   : > { %610 = vst.msk [vmem:[#allocation5] sm:$0xff] %vm609_vm4, %v608_v23 }
 0x307   : > { %657 = vst.msk [vmem:[#allocation5] sm:$0xff] %vm656_vm6, %v655_v24 }
 0x30a   : > { %v747_v26 = vpop.xlane.xlu1 %746 }
 0x30d   : > { %v701_v25 = vpop.xlane.xlu0 %700 }
 0x30e   : > { %703 = vst.msk [vmem:[#allocation5] sm:$0xff] %vm702_vm5, %v701_v25 }
 0x30f   : > { %749 = vst.msk [vmem:[#allocation5] sm:$0xff] %vm748_vm7, %v747_v26 }
 0x316   : > { %v784_v27 = vld [vmem:[#allocation5] sm:$0xff] }
 0x317   : > { %968 = vperm.xlu1 %1825, %v784_v27   ;;  %842 = vperm.xlu0 %1824, %v784_v27  }
 0x31b   : > { %1826 = vset.pattern.permute.xlu1 %v2061_v28  ;;  %1828 = vset.pattern.permute.xlu0 %v2062_v29 }
 0x31c   : > { %1099 = vperm.xlu1 %1826, %v784_v27  }
 0x320   : > { %1827 = vset.pattern.permute.xlu1 %v2062_v29 }
 0x321   : > { %1230 = vperm.xlu1 %1827, %v784_v27  }
 0x392   : > { %v969_v35 = vpop.permute.xlu1 %968  ;;  %v843_v36 = vpop.permute.xlu0 %842 }
 0x393   : > { %vm975_vm8 = vcmp.eq.f32.partialorder %v969_v35, %v974_v33  ;;  %vm849_vm9 = vcmp.eq.f32.partialorder %v843_v36, %v848_v34 }
 0x394   : > { %v976_v38 = vsel %vm975_vm8, %v2365_v51, -inf  ;;  %v850_v40 = vsel %vm849_vm9, %v2356_v20, -inf }
 0x395   : > { %v977_v41 = vsel %vm600_vm3, %v976_v38, -inf  ;;  %v851_v42 = vsel %vm600_vm3, %v850_v40, -inf }
 0x396   : > { %978 = vmax.xlane.f32.xlu0 %v977_v41  ;;  %852 = vmax.xlane.f32.xlu1 %v851_v42 }
 0x397   : > { %v1100_v44 = vpop.permute.xlu1 %1099 }
 0x398   : > { %vm1106_vm10 = vcmp.eq.f32.partialorder %v1100_v44, %v1105_v43 }
 0x399   : > { %v1107_v46 = vsel %vm1106_vm10, %v1092_v10, -inf }
 0x39a   : > { %v1108_v47 = vsel %vm600_vm3, %v1107_v46, -inf }
 0x39b   : > { %1109 = vmax.xlane.f32.xlu1 %v1108_v47  ;;  %v1310_v47 = vld [vmem:[#allocation13 + $0x18] sm:$0xff] }
 0x39c   : > { %v1231_v49 = vpop.permute.xlu1 %1230  ;;  %1698 = vmatpush3.msra.mxu0 %v1310_v47 }
 0x39d   : > { %vm1237_vm11 = vcmp.eq.f32.partialorder %v1231_v49, %v1236_v48  ;;  %v1309_v48 = vld [vmem:[#allocation13 + $0x10] sm:$0xff]  ;;  %1699 = vmatprep.subr.mxu0 %v2047_v0 }
 0x39e   : > { %v1238_v50 = vsel %vm1237_vm11, %v1223_v15, -inf  ;;  %1700 = vmatpush3.msra.mxu0 %v1309_v48 }
 0x39f   : > { %v1239_v20 = vsel %vm600_vm3, %v1238_v50, -inf  ;;  %1701 = vmatprep.subr.mxu0 %v2047_v0 }
 0x3a0   : > { %1240 = vmax.xlane.f32.xlu1 %v1239_v20 }
 0x3b1   : > { %639 = vrot.lane.b32.xlu1 %v2281_v17, %s2063_s10 }
 0x41f   : > { %v979_v51 = vpop.xlane.xlu0 %978  ;;  %v853_v52 = vpop.xlane.xlu1 %852 }
 0x420   : > { %v980_v53 = vsub.f32 %v976_v38, %v979_v51  ;;  %v854_v54 = vsub.f32 %v850_v40, %v853_v52  ;;  %v1307_v52 = vld [vmem:[#allocation13] sm:$0xff] }
 0x422   : > { %v855_v58 = vmul.f32 1.442695, %v854_v54  ;;  %v981_v55 = vmul.f32 1.442695, %v980_v53 }
 0x424   : > { %v1110_v56 = vpop.xlane.xlu1 %1109  ;;  %1829 = vpow2.f32 %v855_v58 }
 0x425   : > { %v1111_v57 = vsub.f32 %v1107_v46, %v1110_v56  ;;  %1831 = vpow2.f32 %v981_v55 }
 0x427   : > { %v1112_v18 = vmul.f32 1.442695, %v1111_v57 }
 0x429   : > { %1833 = vpow2.f32 %v1112_v18  ;;  %v1241_v12 = vpop.xlane.xlu1 %1240 }
 0x42a   : > { %v1242_v59 = vsub.f32 %v1238_v50, %v1241_v12  ;;  %v1308_v50 = vld [vmem:[#allocation13 + $0x8] sm:$0xff] }
 0x42b   : > { %1702 = vmatpush3.msra.mxu0 %v1308_v50 }
 0x42c   : > { %v1243_v60 = vmul.f32 1.442695, %v1242_v59  ;;  %1703 = vmatprep.subr.mxu0 %v2047_v0 }
 0x42d   : > { %v640_v61 = vpop.permute.xlu1 %639  ;;  %1704 = vmatpush3.msra.mxu0 %v1307_v52 }
 0x42e   : > { %1835 = vpow2.f32 %v1243_v60  ;;  %642 = vst.msk [vmem:[#allocation4] sm:$0xf] %vm630_vm2, %v640_v61  ;;  %v1573_v61 = vld [vmem:[%s2486_s4] ss:$0 sm:$0xff] }
 0x431   : > { %v1830_v62 = vpop.eup %1829 }
 0x432   : > { %v857_v63 = vsel %vm600_vm3, %v1830_v62, 0.0  ;;  %v1832_v1 = vpop.eup %1831 }
 0x433   : > { %858 = vadd.xlane.f32.xlu1 %v857_v63  ;;  %v983_v5 = vsel %vm600_vm3, %v1832_v1, 0.0 }
 0x435   : > { %v792_v2 = vld [vmem:[#allocation4] sm:$0xf] }
 0x436   : > { %v1834_v3 = vpop.eup %1833  ;;  %v868_v4 = vsel %vm866_vm12, %v792_v2, 0 }
 0x437   : > { %1656 = vmatpush3.bf16.msra.mxu1 %v868_v4  ;;  %v1114_v6 = vsel %vm600_vm3, %v1834_v3, 0.0  ;;  %984 = vadd.xlane.f32.xlu1 %v983_v5 }
 0x438   : > { %1115 = vadd.xlane.f32.xlu0 %v1114_v6  ;;  %1667 = vmatprep.subr.bf16.mxu1 %v2047_v0 }
 0x43b   : > { %v1836_v7 = vpop.eup %1835 }
 0x43c   : > { %v1245_v8 = vsel %vm600_vm3, %v1836_v7, 0.0 }
 0x43d   : > { %1246 = vadd.xlane.f32.xlu0 %v1245_v8 }
 0x448   : > { %731 = vrot.lane.b32.xlu1 %v2281_v17, %s2064_s3 }
 0x44c   : > { %777 = vrot.lane.b32.xlu1 %v2281_v17, %s2065_s29 }
 0x453   : > { %685 = vrot.lane.b32.xlu0 %v2281_v17, %s2066_s7 }
 0x4bc   : > { %v859_v10 = vpop.xlane.xlu1 %858 }
 0x4bd   : > { %1837 = vrcp.f32 %v859_v10 }
 0x4c0   : > { %v985_v11 = vpop.xlane.xlu1 %984 }
 0x4c1   : > { %v1116_v9 = vpop.xlane.xlu0 %1115  ;;  %1839 = vrcp.f32 %v985_v11 }
 0x4c2   : > { %1841 = vrcp.f32 %v1116_v9 }
 0x4c4   : > { %v732_v13 = vpop.permute.xlu1 %731 }
 0x4c5   : > { %735 = vst.msk [vmem:[#allocation4 + $0x8] sm:$0xf] %vm630_vm2, %v732_v13 }
 0x4c6   : > { %v1247_v14 = vpop.xlane.xlu0 %1246 }
 0x4c7   : > { %1843 = vrcp.f32 %v1247_v14 }
 0x4c8   : > { %v778_v15 = vpop.permute.xlu1 %777 }
 0x4c9   : > { %781 = vst.msk [vmem:[#allocation4 + $0xc] sm:$0xf] %vm630_vm2, %v778_v15 }
 0x4ca   : > { %v686_v16 = vpop.permute.xlu0 %685  ;;  %v1838_v19 = vpop.eup %1837 }
 0x4cb   : > { %689 = vst.msk [vmem:[#allocation4 + $0x4] sm:$0xf] %vm630_vm2, %v686_v16  ;;  %v861_v21 = vmul.f32 %v1838_v19, %v1830_v62 }
 0x4cc   : > { %v1051_v25 = vld [vmem:[#allocation4 + $0x8] sm:$0xf] }
 0x4cd   : > { %v862_v39 = vpack.c.bf16 %v861_v21, %v861_v21  ;;  %v1124_v28 = vsel %vm866_vm12, %v1051_v25, 0 }
 0x4ce   : > { %v1840_v17 = vpop.eup %1839 }
 0x4cf   : > { %1658 = vmatmul.mubr.msk.bf16.vlgmr.msra.gmra.mxu1 %vm600_vm3, %v862_v39  ;;  %v987_v23 = vmul.f32 %v1840_v17, %v1832_v1  ;;  %v1842_v27 = vpop.eup %1841 }
 0x4d0   : > { %1669 = vmatprep.mubr.msk.bf16.mxu1 %vm2048_vm0, %v2047_v0  ;;  %v1118_v29 = vmul.f32 %v1842_v27, %v1834_v3  ;;  %v1182_v30 = vld [vmem:[#allocation4 + $0xc] sm:$0xf] }
 0x4d1   : > { %v988_v26 = vpack.c.bf16 %v987_v23, %v987_v23  ;;  %v1255_v33 = vsel %vm866_vm12, %v1182_v30, 0 }
 0x4d2   : > { %v920_v22 = vld [vmem:[#allocation4 + $0x4] sm:$0xf]  ;;  %v1119_v31 = vpack.c.bf16 %v1118_v29, %v1118_v29 }
 0x4d3   : > { %v993_v24 = vsel %vm866_vm12, %v920_v22, 0 }
 0x4d4   : > { %1668 = vmatpush3.bf16.msra.mxu1 %v993_v24  ;;  %v1844_v32 = vpop.eup %1843 }
 0x4d5   : > { %1679 = vmatprep.subr.bf16.mxu1 %v2047_v0  ;;  %v1249_v34 = vmul.f32 %v1844_v32, %v1836_v7 }
 0x4d7   : > { %1670 = vmatmul.mubr.msk.bf16.vlgmr.msra.gmra.mxu1 %vm600_vm3, %v988_v26  ;;  %v1250_v35 = vpack.c.bf16 %v1249_v34, %v1249_v34 }
 0x4d8   : > { %1680 = vmatpush3.bf16.msra.mxu1 %v1124_v28  ;;  %1681 = vmatprep.mubr.msk.bf16.mxu1 %vm2048_vm0, %v2047_v0 }
 0x4d9   : > { %1691 = vmatprep.subr.bf16.mxu1 %v2047_v0 }
 0x4df   : > { %1682 = vmatmul.mubr.msk.bf16.vlgmr.msra.gmra.mxu1 %vm600_vm3, %v1119_v31 }
 0x4e0   : > { %1692 = vmatpush3.bf16.msra.mxu1 %v1255_v33  ;;  %1693 = vmatprep.mubr.msk.bf16.mxu1 %vm2048_vm0, %v2047_v0  ;;  %vm1042_vm0 = vcmask 126016  }
 0x4e7   : > { %1694 = vmatmul.mubr.msk.bf16.vlgmr.msra.gmra.mxu1 %vm600_vm3, %v1250_v35  ;;  %vm1304_vm3 = vcmask 257216  }
 0x58f   : > { %v904_v36 = vpop.f32.mrf.mxu1 }
 0x590   : > { %v910_v37 = vpack.c.bf16 %v904_v36, %v904_v36 }
 0x591   : > { %v1659_v38 = vpop.f32.mrf.mxu1 }
 0x592   : > { %912 = vst.msk [vmem:[#allocation7] sm:$0xf] %vm630_vm2, %v910_v37  ;;  %vm1173_vm2 = vcmask 191616  }
 0x593   : > { %v907_v40 = vpop.f32.mrf.mxu1 }
 0x595   : > { %v1660_v41 = vpop.f32.mrf.mxu1 }
 0x597   : > { %v1029_v42 = vpop.f32.mrf.mxu1 }
 0x598   : > { %v1580_v43 = vpack.c.bf16 %v1029_v42, %v1029_v42 }
 0x599   : > { %v1671_v44 = vpop.f32.mrf.mxu1 }
 0x59a   : > { %1039 = vrot.lane.b32.xlu1 %v1580_v43, %s2049_s1 }
 0x59b   : > { %v1032_v45 = vpop.f32.mrf.mxu1 }
 0x59d   : > { %v1672_v46 = vpop.f32.mrf.mxu1 }
 0x59f   : > { %v1160_v49 = vpop.f32.mrf.mxu1 }
 0x5a0   : > { %v1581_v20 = vpack.c.bf16 %v1160_v49, %v1160_v49 }
 0x5a1   : > { %v1683_v51 = vpop.f32.mrf.mxu1 }
 0x5a2   : > { %1170 = vrot.lane.b32.xlu0 %v1581_v20, %s2058_s18  ;;  %s1955_s18 = sshll.u32 %s2067_s16, 4  ;;  %s1956_s18 = int_to_ptr.vmem [resolvable:$false] %s1955_s18 }
 0x5a3   : > { %v1163_v53 = vpop.f32.mrf.mxu1  ;;  %s1957_s10 = scalar_lea.vmem %s1956_s18, 256  ;;  %p1958_p7 = scmp.lt.s32.totalorder %s2435_s11, %s1956_s18 }
 0x5a5   : > { %v1684_v54 = vpop.f32.mrf.mxu1 }
 0x5a7   : > { %v1291_v58 = vpop.f32.mrf.mxu1 }
 0x5a8   : > { %v1582_v55 = vpack.c.bf16 %v1291_v58, %v1291_v58 }
 0x5a9   : > { %v1695_v56 = vpop.f32.mrf.mxu1 }
 0x5aa   : > { %1301 = vrot.lane.b32.xlu1 %v1582_v55, %s2057_s14  ;;  %s1951_s14 = scalar_lea.vmem %s2435_s11, 128 }
 0x5ab   : > { %v1294_v57 = vpop.f32.mrf.mxu1  ;;  %p1952_p10 = scmp.ne.s32.totalorder %s2435_s11, %s1951_s14  ;;  %p1959_p6 = scmp.lt.s32.totalorder %s1957_s10, %s1951_s14 }
 0x5ad   : > { %v1696_v18 = vpop.f32.mrf.mxu1  ;;  %p1953_p2 = pnand %p1952_p10, %p2203_p0  ;;  %p1960_p9 = por %p1959_p6, %p1958_p7 }
 0x5af   : > { %p1954_p11 = pneg %p1953_p2 }
 0x5b1   : > { %p1961_p13 = pnand %p1960_p9, %p1954_p11 }
 0x60c   : > { %v1040_v12 = vpop.permute.xlu1 %1039 }
 0x60d   : > { %1043 = vst.msk [vmem:[#allocation7] sm:$0xf] %vm1042_vm0, %v1040_v12 }
 0x614   : > { %v1171_v59 = vpop.permute.xlu0 %1170 }
 0x615   : > { %1174 = vst.msk [vmem:[#allocation7] sm:$0xf] %vm1173_vm2, %v1171_v59 }
 0x61c   : > { %v1302_v0 = vpop.permute.xlu1 %1301 }
 0x61d   : > { %1305 = vst.msk [vmem:[#allocation7] sm:$0xf] %vm1304_vm3, %v1302_v0 }
 0x624   : > { %v1306_v60 = vld [vmem:[#allocation7] sm:$0xf] }
 0x625   : > { %1706 = vmatmul.mubr.msk.bf16.vlgmr.msra.gmra.mxu0 %vm342_vm1, %v1306_v60 }
 0x6e5   : > { %v1388_v62 = vpop.f32.mrf.mxu0 }
 0x6e6   : > { %v1389_v63 = vadd.f32 %v1573_v61, %v1388_v62 }
 0x6e7   : > { %v1707_v1 = vpop.f32.mrf.mxu0 }
 0x6e8   : > { %1394 = vst.msk [vmem:[%s324_s30] sm:$0xff] %vm342_vm1, %v1389_v63 }
 0x6e9   : > { %v1391_v2 = vpop.f32.mrf.mxu0 }
 0x6ea   : > { %1964 = shalt.err (!%p1961_p13)
}
 0x6eb   : > { %s1965_s3 = scalar_lea.hbm %s2433_s28, 128  ;;  %s1969_s7 = scalar_lea.hbm %s2488_s6, 256 }
 0x6ec   : > { %p1966_p1 = scmp.ne.s32.totalorder %s2433_s28, %s1965_s3  ;;  %p1970_p12 = scmp.lt.s32.totalorder %s2433_s28, %s2488_s6 }
 0x6ed   : > { %p1971_p5 = scmp.lt.s32.totalorder %s1969_s7, %s1965_s3 }
 0x6ee   : > { %p1967_p4 = pnand %p1966_p1, %p2203_p0 }
 0x6ef   : > { %p1972_p3 = por %p1971_p5, %p1970_p12 }
 0x6f0   : > { %p1968_p8 = pneg %p1967_p4 }
 0x6f2   : > { %p1973_p10 = pnand %p1972_p3, %p1968_p8 }
 0x6f4   : > { %1976 = shalt.err (!%p1973_p10)
}
 0x6f5   : > { %1723 = dma.vmem_to_hbm [thread:$0]  (%p2203_p0), %s2435_s11, 128, %s2433_s28, %s1396_s24   ;;  %v1708_v3 = vpop.f32.mrf.mxu0 }
 0x6f6 PF: > { %s1422_s13 = sand.u32 1, %s2019_s21   ;;  %p2508_p2 = scmp.ne.s32.totalorder %s2498_s8, 0 }
 0x6f7   : > { %p2509_p11 = scmp.ge.s32.totalorder %s2039_s26, 2  ;;  %s1423_s30 = scalar_lea.sflag [#allocation10], %s1422_s13 }
 0x6f9   : > { %p1740_p7 = pnand %p2509_p11, %p2508_p2 }
 0x6fb   : > { %p1741_p6 = pneg %p1740_p7 }
 0x6fd   : > { %2014 = dma.done.wait (%p1741_p6), %s1423_s30, 128  }
 0x6fe   : > { %2016 = vsyncadd (%p1741_p6), %s1423_s30, 4294967168  ;;  %s24_s26 = sadd.s32 1, %s2039_s26   ;;  %s2510_s21 = smov %s2023_s22 }
 0x6ff   : > { %p21_p9 = scmp.ge.s32.totalorder %s24_s26, 4   ;;  %s2511_s22 = smov %s2027_s23 }
 0x700   : > { %s2512_s23 = smov %s2215_s19  ;;  %s2513_s24 = smov %s2035_s25 }
 0x701   : > { %s2514_s25 = smov %s2516_s20  ;;  %23 = sbr.rel (!%p21_p9) target bundleno = 11 (0xb), region = 128 }
 0x706   :  { %1428 = vsyncpa [#allocation9], 1 }
 0x707   :  { %1430 = vsyncpa [#allocation9 + $0x1], 1 }
 0x708   :  { %1431 = vsyncpa [#allocation12], 1 }
 0x709   :  { %1432 = vsyncpa [#allocation15], 1 }
 0x70a   :  { %1433 = vsyncpa [#allocation10], 1 }
 0x70b   :  { %1435 = vsyncpa [#allocation10 + $0x1], 1 }

</bundles_post_ra>
